<compile_context>
chip_gen: v7x
topology: tpu7x:2x2x1
jax: 0.10.0
libtpu: 0.0.40
codegen_flags: <defaults>
</compile_context>

<pallas_src>
from typing import Dict, List, Optional

import numpy as np

import jax
import jax.numpy as jnp
from jax.experimental import pallas as pl
from jax.experimental.pallas import tpu as pltpu


# ----------------------------------------------------------------------------
# Fused kernel factory.  All shape / presence information is static.
# ----------------------------------------------------------------------------
def _make_fused_kernel(B, C, N, M, Nm, has_view, view_d, has_sym, sym_d):
    f32 = jnp.float32
    inv_nm = 1.0 / float(Nm)             # pose:          mean over Nm points
    inv_interv = 1.0 / float(B * N * 3)  # interventions: MSE over B*N*3
    inv_bd = 1.0 / float(B * N * M)      # backdoor:      MSE over B*N*M

    def kernel(*refs):
        it = iter(refs)
        q_ref = next(it)       # (4,)    quaternion, SMEM scalars
        t_ref = next(it)       # (3,)    translation, SMEM scalars
        pts_ref = next(it)     # (8, Nm) rows 0-2 model pts, 3-5 target, VMEM
        rel_ref = next(it)     # (B, C, N) relational features, channel-major
        glob_ref = next(it)    # (B, C, M) global features, channel-major
        view_ref = next(it) if has_view else None   # (B, view_d*view_d) SMEM
        sym_ref = next(it) if has_sym else None     # (B, sym_d*sym_d)   SMEM
        out_ref = next(it)     # (1, 128) packed losses, VMEM

        def splat(v):          # SMEM scalar -> (1, 1) f32 (keeps math on VPU)
            return jnp.full((1, 1), v, f32)

        # ------------------------- pose loss -------------------------------
        # Unnormalized quaternion q; rotation entries use q_i*q_j / (|q|+eps)^2
        # so only one sqrt + one (approx) EUP reciprocal are needed.
        q0 = splat(q_ref[0])
        q1 = splat(q_ref[1])
        q2 = splat(q_ref[2])
        q3 = splat(q_ref[3])
        s = q0 * q0 + q1 * q1 + q2 * q2 + q3 * q3          # (1, 1)
        d = jnp.sqrt(s) + 1e-8                              # |q| + eps
        inv = pl.reciprocal(d * d, approx=True)             # 1/(|q|+eps)^2

        # base (pre-transpose) rows of the reference; pred = mp @ base^T.
        R00 = 1.0 - 2.0 * (q2 * q2 + q3 * q3) * inv
        R01 = 2.0 * (q1 * q2 - q0 * q3) * inv
        R02 = 2.0 * (q0 * q2 + q1 * q3) * inv
        R10 = 2.0 * (q1 * q2 + q3 * q0) * inv
        R11 = 1.0 - 2.0 * (q1 * q1 + q3 * q3) * inv
        R12 = 2.0 * (q2 * q3 - q0 * q1) * inv
        R20 = 2.0 * (q1 * q3 - q0 * q2) * inv
        R21 = 2.0 * (q0 * q1 + q2 * q3) * inv
        R22 = 1.0 - 2.0 * (q1 * q1 + q2 * q2) * inv

        mx = pts_ref[0:1, :]   # (1, Nm) lane-dense model-point coords
        my = pts_ref[1:2, :]
        mz = pts_ref[2:3, :]
        tx = pts_ref[3:4, :]   # target coords
        ty = pts_ref[4:5, :]
        tz = pts_ref[5:6, :]
        # 9 broadcast FMAs on the VPU (no MXU for a K=3 contraction).  At
        # Nm=16 everything fits in a fraction of a vreg; stacking the three
        # rows into one (3, Nm) tile only pays off if Nm grows.
        dx = R00 * mx + R01 * my + R02 * mz + t_ref[0] - tx
        dy = R10 * mx + R11 * my + R12 * mz + t_ref[1] - ty
        dz = R20 * mx + R21 * my + R22 * mz + t_ref[2] - tz
        dist = jnp.sqrt(dx * dx + dy * dy + dz * dz)         # (1, Nm)
        dis = jnp.sum(dist, axis=1, keepdims=True) * inv_nm  # (1, 1)
        # Reference: if dis > 1 -> clamp(dis, 0, 1); else dis.mean()  == min(dis, 1).
        pose = jnp.minimum(dis, 1.0)

        # ----------------- interventions + backdoor (one pass over rel) ----
        # Lane-vector accumulators; the single cross-lane reduce per loss is
        # deferred to the finalize block (XLU stays off the critical path).
        view_acc = jnp.zeros((1, N), f32)
        sym_acc = jnp.zeros((1, N), f32)
        bd_acc = jnp.zeros((1, N), f32)

        for b in range(B):                    # static unroll; B is tiny here
            p = rel_ref[b]                    # (C, N) channel-major tile
            x = p[0:1, :]                     # spatial channels, (1, N)
            y = p[1:2, :]
            z = p[2:3, :]

            if has_view:
                def mv(i, j, _b=b):
                    # f32 scalar from SMEM -> splat operand for the VPU FMAs
                    return view_ref[_b, i * view_d + j]
                ex = mv(0, 0) * x + mv(0, 1) * y + mv(0, 2) * z - x
                ey = mv(1, 0) * x + mv(1, 1) * y + mv(1, 2) * z - y
                ez = mv(2, 0) * x + mv(2, 1) * y + mv(2, 2) * z - z
                if view_d == 4:               # affine: add translation column
                    ex = ex + mv(0, 3)
                    ey = ey + mv(1, 3)
                    ez = ez + mv(2, 3)
                view_acc = view_acc + (ex * ex + ey * ey + ez * ez)

            if has_sym:
                def ms(i, j, _b=b):
                    return sym_ref[_b, i * sym_d + j]
                sx = ms(0, 0) * x + ms(0, 1) * y + ms(0, 2) * z - x
                sy = ms(1, 0) * x + ms(1, 1) * y + ms(1, 2) * z - y
                sz = ms(2, 0) * x + ms(2, 1) * y + ms(2, 2) * z - z
                if sym_d == 4:
                    sx = sx + ms(0, 3)
                    sy = sy + ms(1, 3)
                    sz = sz + ms(2, 3)
                sym_acc = sym_acc + (sx * sx + sy * sy + sz * sz)

            # ---- backdoor: normalize over the C (sublane) axis ------------
            g = glob_ref[b]                                        # (C, M)
            # 1 / max(||.||, 1e-12) == rsqrt(max(||.||^2, 1e-24))  -> EUP
            inv_p = jax.lax.rsqrt(jnp.maximum(
                jnp.sum(p * p, axis=0, keepdims=True), 1e-24))     # (1, N)
            inv_g = jax.lax.rsqrt(jnp.maximum(
                jnp.sum(g * g, axis=0, keepdims=True), 1e-24))     # (1, M)
            pn = p * inv_p                                         # hoisted
            gs = g * inv_g                                         # hoisted
            # TODO(synk): for lane-dense M (>=128) this should become one
            # (N, C) x (C, M) MXU dot; at M ~ 1 the VPU path is far cheaper.
            for m in range(M):
                sim = jnp.sum(pn * gs[:, m:m + 1],
                              axis=0, keepdims=True)               # (1, N)
                bd_acc = bd_acc + sim * sim

        # --------------------------- finalize -------------------------------
        bd_loss = jnp.sum(bd_acc, axis=1, keepdims=True) * inv_bd
        total = pose + 0.1 * bd_loss           # reference hard-codes 0.1 for
                                               # every non-pose loss
        lane = jax.lax.broadcasted_iota(jnp.int32, (1, 128), 1)
        out = jnp.where(lane == 0, pose, jnp.zeros((1, 128), f32))
        if has_view:
            view_loss = jnp.sum(view_acc, axis=1, keepdims=True) * inv_interv
            total = total + 0.1 * view_loss
            out = jnp.where(lane == 1, view_loss, out)
        if has_sym:
            sym_loss = jnp.sum(sym_acc, axis=1, keepdims=True) * inv_interv
            total = total + 0.1 * sym_loss
            out = jnp.where(lane == 2, sym_loss, out)
        out = jnp.where(lane == 3, bd_loss, out)
        out = jnp.where(lane == 4, total, out)
        out_ref[...] = out                     # single unmasked (1,128) store

    return kernel


# ----------------------------------------------------------------------------
# Single fused pallas_call (no grid: everything fits in one VMEM-resident block)
# ----------------------------------------------------------------------------
def _fused_scm_loss_call(q4, t3, pts, rel, glob,
                         view_flat, view_d, sym_flat, sym_d):
    B, C, N = rel.shape
    M = glob.shape[-1]
    Nm = pts.shape[1]
    has_view = view_flat is not None
    has_sym = sym_flat is not None

    kernel = _make_fused_kernel(B, C, N, M, Nm, has_view, view_d, has_sym, sym_d)

    def vmem():
        return pl.BlockSpec(memory_space=pltpu.MemorySpace.VMEM)

    def smem():
        return pl.BlockSpec(memory_space=pltpu.MemorySpace.SMEM)

    inputs = [q4, t3, pts, rel, glob]
    in_specs = [smem(), smem(), vmem(), vmem(), vmem()]
    if has_view:
        inputs.append(view_flat)
        in_specs.append(smem())
    if has_sym:
        inputs.append(sym_flat)
        in_specs.append(smem())

    # Advisory cost estimate: keeps XLA from treating this µs-scale custom
    # call as opaque/expensive and serializing around it.
    n_interv = int(has_view) + int(has_sym)
    bytes_in = sum(int(np.prod(a.shape)) * 4 for a in inputs) + 128 * 4
    cost = pl.CostEstimate(
        flops=int(2 * B * C * N * M + 8 * B * C * N
                  + 30 * B * N * n_interv + 40 * Nm + 64),
        transcendentals=int(Nm + B * (N + M) + 2),
        bytes_accessed=int(bytes_in))

    return pl.pallas_call(
        kernel,
        out_shape=jax.ShapeDtypeStruct((1, 128), jnp.float32),
        in_specs=in_specs,
        out_specs=pl.BlockSpec(memory_space=pltpu.MemorySpace.VMEM),
        cost_estimate=cost,
    )(*inputs)


# ----------------------------------------------------------------------------
# Module-level wrapper reproducing SCMLoss.forward
# ----------------------------------------------------------------------------
class SCMLossPallas:
    def __init__(self, num_points_mesh: int, sym_list: List[int]):
        self.num_pt_mesh = num_points_mesh
        # Kept for API parity; the reference forward never uses sym_list.
        self.sym_list = sym_list
        # Declared exactly like the reference, but (also exactly like the
        # reference forward) the hard-coded 0.1 weighting is what is applied.
        self.loss_weights = {'pose_loss': 1.0, 'view_loss': 0.1,
                             'symmetry_loss': 0.1, 'backdoor_loss': 0.01}

    @staticmethod
    def _flatten_intervention(mat, batch):
        if mat.shape[-2:] == (3, 3):
            d = 3
        elif mat.shape[-2:] == (4, 4):
            d = 4
        else:
            raise ValueError(
                f'Unexpected intervention shape {mat.shape}, '
                f'expected [B, 4, 4] or [B, 3, 3]')
        return jnp.reshape(mat.astype(jnp.float32), (batch, d * d)), d

    def __call__(self, pred_r, pred_t, target, model_points, points,
                 features: Dict[str, jax.Array],
                 interventions: Optional[Dict[str, jax.Array]] = None):
        nm = self.num_pt_mesh
        f32 = jnp.float32

        q_full = jnp.reshape(pred_r, (-1,)).astype(f32)
        if q_full.shape[0] < 4:
            raise ValueError(f'pred_r must have >= 4 elements, got {q_full.shape}')
        q4 = q_full[:4]                                        # (4,)  -> SMEM
        t3 = jnp.reshape(pred_t, (3,)).astype(f32)             # (3,)  -> SMEM

        # One cheap XLA concat buys a single sublane-full (8, Nm) pose tile
        # (rows 0-2 model points, 3-5 target, 6-7 pad) instead of two
        # partially-filled 3-sublane inputs.
        mp_t = jnp.reshape(model_points, (nm, 3)).astype(f32).T   # (3, Nm)
        tgt_t = jnp.reshape(target, (nm, 3)).astype(f32).T        # (3, Nm)
        pts = jnp.concatenate([mp_t, tgt_t, jnp.zeros((2, nm), f32)], axis=0)

        rel = features['relational'].astype(f32)              # (B, C, N)
        glob = features['global'].astype(f32)                 # (B, C, M)
        batch = rel.shape[0]

        view_flat = sym_flat = None
        view_d = sym_d = 0
        if interventions is not None:
            if 'view' in interventions:
                view_flat, view_d = self._flatten_intervention(
                    interventions['view'], batch)
            if 'symmetry' in interventions:
                sym_flat, sym_d = self._flatten_intervention(
                    interventions['symmetry'], batch)

        out = _fused_scm_loss_call(q4, t3, pts, rel, glob,
                                   view_flat, view_d, sym_flat, sym_d)
        # Fixed lane assignment: 0 pose, 1 view, 2 sym, 3 backdoor, 4 total.
        losses = {'pose_loss': out[0, 0]}
        if view_flat is not None:
            losses['view_loss'] = out[0, 1]
        if sym_flat is not None:
            losses['symmetry_loss'] = out[0, 2]
        losses['backdoor_loss'] = out[0, 3]
        losses['total_loss'] = out[0, 4]
        # TODO(synk): the reference prints 'Pose Loss: ...' every forward;
        # side-effecting prints are skipped here.
        return losses


# ----------------------------------------------------------------------------
# Pure-JAX reference (mirrors the PyTorch math) for a numerical self-check.
# ----------------------------------------------------------------------------
def _reference_losses(pred_r, pred_t, target, model_points, features,
                      interventions, num_pt_mesh):
    q = pred_r.reshape(-1).astype(jnp.float32)
    q = q / (jnp.sqrt(jnp.sum(q * q)) + 1e-8)
    r0, r1, r2, r3 = q[0], q[1], q[2], q[3]
    base = jnp.stack([
        1.0 - 2.0 * (r2 * r2 + r3 * r3),
        2.0 * r1 * r2 - 2.0 * r0 * r3,
        2.0 * r0 * r2 + 2.0 * r1 * r3,
        2.0 * r1 * r2 + 2.0 * r3 * r0,
        1.0 - 2.0 * (r1 * r1 + r3 * r3),
        -2.0 * r0 * r1 + 2.0 * r2 * r3,
        -2.0 * r0 * r2 + 2.0 * r1 * r3,
        2.0 * r0 * r1 + 2.0 * r2 * r3,
        1.0 - 2.0 * (r1 * r1 + r2 * r2)]).reshape(3, 3)
    mp = model_points.reshape(num_pt_mesh, 3).astype(jnp.float32)
    tg = target.reshape(num_pt_mesh, 3).astype(jnp.float32)
    pred = mp @ base.T + pred_t.reshape(1, 3).astype(jnp.float32)
    dis = jnp.mean(jnp.sqrt(jnp.sum((pred - tg) ** 2, axis=-1)))
    pose = jnp.minimum(dis, 1.0)

    rel = features['relational'].astype(jnp.float32)
    glob = features['global'].astype(jnp.float32)
    B, _, N = rel.shape

    def interv_loss(mat):
        spatial = jnp.swapaxes(rel, 1, 2)[..., :3]
        if mat.shape[-1] == 4:
            homog = jnp.concatenate(
                [spatial, jnp.ones((B, N, 1), jnp.float32)], axis=-1)
        else:
            homog = spatial
        tr = jnp.einsum('bnj,bij->bni', homog,
                        mat.astype(jnp.float32))[..., :3]
        return jnp.mean((tr - spatial) ** 2)

    losses = {'pose_loss': pose}
    if interventions is not None:
        if 'view' in interventions:
            losses['view_loss'] = interv_loss(interventions['view'])
        if 'symmetry' in interventions:
            losses['symmetry_loss'] = interv_loss(interventions['symmetry'])

    pn = rel / jnp.maximum(
        jnp.sqrt(jnp.sum(rel ** 2, axis=1, keepdims=True)), 1e-12)
    gn = glob / jnp.maximum(
        jnp.sqrt(jnp.sum(glob ** 2, axis=1, keepdims=True)), 1e-12)
    sim = jnp.einsum('bcn,bcm->bnm', pn, gn)
    losses['backdoor_loss'] = jnp.mean(sim ** 2)

    total = pose
    for name, val in losses.items():
        if name != 'pose_loss':
            total = total + 0.1 * val
    losses['total_loss'] = total
    return losses


# ----------------------------------------------------------------------------
if __name__ == "__main__":
    key = jax.random.PRNGKey(0)
    ks = jax.random.split(key, 9)

    num_pt_mesh = 16        # pose-loss model points
    B, C, Np = 2, 32, 16    # feature batch / channels / points
    M = 1                   # global feature width

    pred_r = jax.random.normal(ks[0], (4,), jnp.float32)
    pred_t = 0.1 * jax.random.normal(ks[1], (3,), jnp.float32)
    model_points = 0.1 * jax.random.normal(ks[2], (1, num_pt_mesh, 3), jnp.float32)
    target = 0.1 * jax.random.normal(ks[3], (1, num_pt_mesh, 3), jnp.float32)
    points = jax.random.normal(ks[4], (1, num_pt_mesh, 3), jnp.float32)
    features = {
        'relational': jax.random.normal(ks[5], (B, C, Np), jnp.float32),
        'global': jax.random.normal(ks[6], (B, C, M), jnp.float32),
    }
    interventions = {
        'view': jax.random.normal(ks[7], (B, 4, 4), jnp.float32),
        'symmetry': jax.random.normal(ks[8], (B, 3, 3), jnp.float32),
    }

    loss_mod = SCMLossPallas(num_points_mesh=num_pt_mesh, sym_list=[0])
    losses = loss_mod(pred_r, pred_t, target, model_points, points,
                      features, interventions)
    losses = jax.block_until_ready(losses)

    ref = _reference_losses(pred_r, pred_t, target, model_points, features,
                            interventions, num_pt_mesh)
    ref = jax.block_until_ready(ref)

    for name in ref:
        got = np.asarray(losses[name])
        want = np.asarray(ref[name])
        if not np.allclose(got, want, rtol=2e-3, atol=1e-5):
            raise AssertionError(f"{name}: pallas={got} reference={want}")

    print("KERNEL_OK")
</pallas_src>

<mosaic_0001>
module attributes {stable_mosaic.version = 11 : i64} {
  func.func @kernel(%arg0: memref<4xf32, #tpu.memory_space<smem>>, %arg1: memref<3xf32, #tpu.memory_space<smem>>, %arg2: memref<8x16xf32, #tpu.memory_space<vmem>>, %arg3: memref<2x32x16xf32, #tpu.memory_space<vmem>>, %arg4: memref<2x32x1xf32, #tpu.memory_space<vmem>>, %arg5: memref<2x16xf32, #tpu.memory_space<smem>>, %arg6: memref<2x9xf32, #tpu.memory_space<smem>>, %arg7: memref<1x128xf32, #tpu.memory_space<vmem>>) attributes {dimension_semantics = [], scalar_prefetch = 0 : i64, scratch_operands = 0 : i64, tpu.core_type = #tpu.core_type<tc>} {
    %c0 = arith.constant 0 : index
    %0 = memref.load %arg0[%c0] : memref<4xf32, #tpu.memory_space<smem>>
    %1 = vector.broadcast %0 : f32 to vector<1x1xf32>
    %c1 = arith.constant 1 : index
    %2 = memref.load %arg0[%c1] : memref<4xf32, #tpu.memory_space<smem>>
    %3 = vector.broadcast %2 : f32 to vector<1x1xf32>
    %c2 = arith.constant 2 : index
    %4 = memref.load %arg0[%c2] : memref<4xf32, #tpu.memory_space<smem>>
    %5 = vector.broadcast %4 : f32 to vector<1x1xf32>
    %c3 = arith.constant 3 : index
    %6 = memref.load %arg0[%c3] : memref<4xf32, #tpu.memory_space<smem>>
    %7 = vector.broadcast %6 : f32 to vector<1x1xf32>
    %8 = arith.mulf %1, %1 : vector<1x1xf32>
    %9 = arith.mulf %3, %3 : vector<1x1xf32>
    %10 = arith.addf %8, %9 : vector<1x1xf32>
    %11 = arith.mulf %5, %5 : vector<1x1xf32>
    %12 = arith.addf %10, %11 : vector<1x1xf32>
    %13 = arith.mulf %7, %7 : vector<1x1xf32>
    %14 = arith.addf %12, %13 : vector<1x1xf32>
    %15 = math.sqrt %14 : vector<1x1xf32>
    %cst = arith.constant 9.99999993E-9 : f32
    %16 = vector.broadcast %cst : f32 to vector<1x1xf32>
    %17 = arith.addf %15, %16 : vector<1x1xf32>
    %18 = arith.mulf %17, %17 : vector<1x1xf32>
    %19 = tpu.reciprocal %18 {approx = true} : vector<1x1xf32> -> vector<1x1xf32>
    %20 = arith.mulf %5, %5 : vector<1x1xf32>
    %21 = arith.mulf %7, %7 : vector<1x1xf32>
    %22 = arith.addf %20, %21 : vector<1x1xf32>
    %cst_0 = arith.constant 2.000000e+00 : f32
    %23 = vector.broadcast %cst_0 : f32 to vector<1x1xf32>
    %24 = arith.mulf %23, %22 : vector<1x1xf32>
    %25 = arith.mulf %24, %19 : vector<1x1xf32>
    %cst_1 = arith.constant 1.000000e+00 : f32
    %26 = vector.broadcast %cst_1 : f32 to vector<1x1xf32>
    %27 = arith.subf %26, %25 : vector<1x1xf32>
    %28 = arith.mulf %3, %5 : vector<1x1xf32>
    %29 = arith.mulf %1, %7 : vector<1x1xf32>
    %30 = arith.subf %28, %29 : vector<1x1xf32>
    %cst_2 = arith.constant 2.000000e+00 : f32
    %31 = vector.broadcast %cst_2 : f32 to vector<1x1xf32>
    %32 = arith.mulf %31, %30 : vector<1x1xf32>
    %33 = arith.mulf %32, %19 : vector<1x1xf32>
    %34 = arith.mulf %1, %5 : vector<1x1xf32>
    %35 = arith.mulf %3, %7 : vector<1x1xf32>
    %36 = arith.addf %34, %35 : vector<1x1xf32>
    %cst_3 = arith.constant 2.000000e+00 : f32
    %37 = vector.broadcast %cst_3 : f32 to vector<1x1xf32>
    %38 = arith.mulf %37, %36 : vector<1x1xf32>
    %39 = arith.mulf %38, %19 : vector<1x1xf32>
    %40 = arith.mulf %3, %5 : vector<1x1xf32>
    %41 = arith.mulf %7, %1 : vector<1x1xf32>
    %42 = arith.addf %40, %41 : vector<1x1xf32>
    %cst_4 = arith.constant 2.000000e+00 : f32
    %43 = vector.broadcast %cst_4 : f32 to vector<1x1xf32>
    %44 = arith.mulf %43, %42 : vector<1x1xf32>
    %45 = arith.mulf %44, %19 : vector<1x1xf32>
    %46 = arith.mulf %3, %3 : vector<1x1xf32>
    %47 = arith.mulf %7, %7 : vector<1x1xf32>
    %48 = arith.addf %46, %47 : vector<1x1xf32>
    %cst_5 = arith.constant 2.000000e+00 : f32
    %49 = vector.broadcast %cst_5 : f32 to vector<1x1xf32>
    %50 = arith.mulf %49, %48 : vector<1x1xf32>
    %51 = arith.mulf %50, %19 : vector<1x1xf32>
    %cst_6 = arith.constant 1.000000e+00 : f32
    %52 = vector.broadcast %cst_6 : f32 to vector<1x1xf32>
    %53 = arith.subf %52, %51 : vector<1x1xf32>
    %54 = arith.mulf %5, %7 : vector<1x1xf32>
    %55 = arith.mulf %1, %3 : vector<1x1xf32>
    %56 = arith.subf %54, %55 : vector<1x1xf32>
    %cst_7 = arith.constant 2.000000e+00 : f32
    %57 = vector.broadcast %cst_7 : f32 to vector<1x1xf32>
    %58 = arith.mulf %57, %56 : vector<1x1xf32>
    %59 = arith.mulf %58, %19 : vector<1x1xf32>
    %60 = arith.mulf %3, %7 : vector<1x1xf32>
    %61 = arith.mulf %1, %5 : vector<1x1xf32>
    %62 = arith.subf %60, %61 : vector<1x1xf32>
    %cst_8 = arith.constant 2.000000e+00 : f32
    %63 = vector.broadcast %cst_8 : f32 to vector<1x1xf32>
    %64 = arith.mulf %63, %62 : vector<1x1xf32>
    %65 = arith.mulf %64, %19 : vector<1x1xf32>
    %66 = arith.mulf %1, %3 : vector<1x1xf32>
    %67 = arith.mulf %5, %7 : vector<1x1xf32>
    %68 = arith.addf %66, %67 : vector<1x1xf32>
    %cst_9 = arith.constant 2.000000e+00 : f32
    %69 = vector.broadcast %cst_9 : f32 to vector<1x1xf32>
    %70 = arith.mulf %69, %68 : vector<1x1xf32>
    %71 = arith.mulf %70, %19 : vector<1x1xf32>
    %72 = arith.mulf %3, %3 : vector<1x1xf32>
    %73 = arith.mulf %5, %5 : vector<1x1xf32>
    %74 = arith.addf %72, %73 : vector<1x1xf32>
    %cst_10 = arith.constant 2.000000e+00 : f32
    %75 = vector.broadcast %cst_10 : f32 to vector<1x1xf32>
    %76 = arith.mulf %75, %74 : vector<1x1xf32>
    %77 = arith.mulf %76, %19 : vector<1x1xf32>
    %cst_11 = arith.constant 1.000000e+00 : f32
    %78 = vector.broadcast %cst_11 : f32 to vector<1x1xf32>
    %79 = arith.subf %78, %77 : vector<1x1xf32>
    %c0_12 = arith.constant 0 : index
    %c0_13 = arith.constant 0 : index
    %80 = vector.load %arg2[%c0_12, %c0_13] : memref<8x16xf32, #tpu.memory_space<vmem>>, vector<1x16xf32>
    %c1_14 = arith.constant 1 : index
    %c0_15 = arith.constant 0 : index
    %81 = vector.load %arg2[%c1_14, %c0_15] : memref<8x16xf32, #tpu.memory_space<vmem>>, vector<1x16xf32>
    %c2_16 = arith.constant 2 : index
    %c0_17 = arith.constant 0 : index
    %82 = vector.load %arg2[%c2_16, %c0_17] : memref<8x16xf32, #tpu.memory_space<vmem>>, vector<1x16xf32>
    %c3_18 = arith.constant 3 : index
    %c0_19 = arith.constant 0 : index
    %83 = vector.load %arg2[%c3_18, %c0_19] : memref<8x16xf32, #tpu.memory_space<vmem>>, vector<1x16xf32>
    %c4 = arith.constant 4 : index
    %c0_20 = arith.constant 0 : index
    %84 = vector.load %arg2[%c4, %c0_20] : memref<8x16xf32, #tpu.memory_space<vmem>>, vector<1x16xf32>
    %c5 = arith.constant 5 : index
    %c0_21 = arith.constant 0 : index
    %85 = vector.load %arg2[%c5, %c0_21] : memref<8x16xf32, #tpu.memory_space<vmem>>, vector<1x16xf32>
    %86 = vector.broadcast %27 : vector<1x1xf32> to vector<1x16xf32>
    %87 = arith.mulf %86, %80 : vector<1x16xf32>
    %88 = vector.broadcast %33 : vector<1x1xf32> to vector<1x16xf32>
    %89 = arith.mulf %88, %81 : vector<1x16xf32>
    %90 = arith.addf %87, %89 : vector<1x16xf32>
    %91 = vector.broadcast %39 : vector<1x1xf32> to vector<1x16xf32>
    %92 = arith.mulf %91, %82 : vector<1x16xf32>
    %93 = arith.addf %90, %92 : vector<1x16xf32>
    %c0_22 = arith.constant 0 : index
    %94 = memref.load %arg1[%c0_22] : memref<3xf32, #tpu.memory_space<smem>>
    %95 = vector.broadcast %94 : f32 to vector<1x16xf32>
    %96 = arith.addf %93, %95 : vector<1x16xf32>
    %97 = arith.subf %96, %83 : vector<1x16xf32>
    %98 = vector.broadcast %45 : vector<1x1xf32> to vector<1x16xf32>
    %99 = arith.mulf %98, %80 : vector<1x16xf32>
    %100 = vector.broadcast %53 : vector<1x1xf32> to vector<1x16xf32>
    %101 = arith.mulf %100, %81 : vector<1x16xf32>
    %102 = arith.addf %99, %101 : vector<1x16xf32>
    %103 = vector.broadcast %59 : vector<1x1xf32> to vector<1x16xf32>
    %104 = arith.mulf %103, %82 : vector<1x16xf32>
    %105 = arith.addf %102, %104 : vector<1x16xf32>
    %c1_23 = arith.constant 1 : index
    %106 = memref.load %arg1[%c1_23] : memref<3xf32, #tpu.memory_space<smem>>
    %107 = vector.broadcast %106 : f32 to vector<1x16xf32>
    %108 = arith.addf %105, %107 : vector<1x16xf32>
    %109 = arith.subf %108, %84 : vector<1x16xf32>
    %110 = vector.broadcast %65 : vector<1x1xf32> to vector<1x16xf32>
    %111 = arith.mulf %110, %80 : vector<1x16xf32>
    %112 = vector.broadcast %71 : vector<1x1xf32> to vector<1x16xf32>
    %113 = arith.mulf %112, %81 : vector<1x16xf32>
    %114 = arith.addf %111, %113 : vector<1x16xf32>
    %115 = vector.broadcast %79 : vector<1x1xf32> to vector<1x16xf32>
    %116 = arith.mulf %115, %82 : vector<1x16xf32>
    %117 = arith.addf %114, %116 : vector<1x16xf32>
    %c2_24 = arith.constant 2 : index
    %118 = memref.load %arg1[%c2_24] : memref<3xf32, #tpu.memory_space<smem>>
    %119 = vector.broadcast %118 : f32 to vector<1x16xf32>
    %120 = arith.addf %117, %119 : vector<1x16xf32>
    %121 = arith.subf %120, %85 : vector<1x16xf32>
    %122 = arith.mulf %97, %97 : vector<1x16xf32>
    %123 = arith.mulf %109, %109 : vector<1x16xf32>
    %124 = arith.addf %122, %123 : vector<1x16xf32>
    %125 = arith.mulf %121, %121 : vector<1x16xf32>
    %126 = arith.addf %124, %125 : vector<1x16xf32>
    %127 = math.sqrt %126 : vector<1x16xf32>
    %cst_25 = arith.constant dense<0.000000e+00> : vector<1xf32>
    %128 = vector.multi_reduction <add>, %127, %cst_25 [1] : vector<1x16xf32> to vector<1xf32>
    %129 = vector.shape_cast %128 : vector<1xf32> to vector<1x1xf32>
    %cst_26 = arith.constant 6.250000e-02 : f32
    %130 = vector.broadcast %cst_26 : f32 to vector<1x1xf32>
    %131 = arith.mulf %129, %130 : vector<1x1xf32>
    %cst_27 = arith.constant 1.000000e+00 : f32
    %132 = vector.broadcast %cst_27 : f32 to vector<1x1xf32>
    %133 = arith.minimumf %131, %132 : vector<1x1xf32>
    %cst_28 = arith.constant 0.000000e+00 : f32
    %134 = vector.broadcast %cst_28 : f32 to vector<1x16xf32>
    %cst_29 = arith.constant 0.000000e+00 : f32
    %135 = vector.broadcast %cst_29 : f32 to vector<1x16xf32>
    %cst_30 = arith.constant 0.000000e+00 : f32
    %136 = vector.broadcast %cst_30 : f32 to vector<1x16xf32>
    %c0_31 = arith.constant 0 : index
    %c0_32 = arith.constant 0 : index
    %c0_33 = arith.constant 0 : index
    %137 = vector.load %arg3[%c0_31, %c0_32, %c0_33] : memref<2x32x16xf32, #tpu.memory_space<vmem>>, vector<1x32x16xf32>
    %138 = vector.shape_cast %137 : vector<1x32x16xf32> to vector<32x16xf32>
    %139 = vector.extract_strided_slice %138 {offsets = [0, 0], sizes = [1, 16], strides = [1, 1]} : vector<32x16xf32> to vector<1x16xf32>
    %140 = vector.extract_strided_slice %138 {offsets = [1, 0], sizes = [1, 16], strides = [1, 1]} : vector<32x16xf32> to vector<1x16xf32>
    %141 = vector.extract_strided_slice %138 {offsets = [2, 0], sizes = [1, 16], strides = [1, 1]} : vector<32x16xf32> to vector<1x16xf32>
    %c0_34 = arith.constant 0 : index
    %c0_35 = arith.constant 0 : index
    %142 = memref.load %arg5[%c0_34, %c0_35] : memref<2x16xf32, #tpu.memory_space<smem>>
    %143 = vector.broadcast %142 : f32 to vector<1x16xf32>
    %144 = arith.mulf %143, %139 : vector<1x16xf32>
    %c0_36 = arith.constant 0 : index
    %c1_37 = arith.constant 1 : index
    %145 = memref.load %arg5[%c0_36, %c1_37] : memref<2x16xf32, #tpu.memory_space<smem>>
    %146 = vector.broadcast %145 : f32 to vector<1x16xf32>
    %147 = arith.mulf %146, %140 : vector<1x16xf32>
    %148 = arith.addf %144, %147 : vector<1x16xf32>
    %c0_38 = arith.constant 0 : index
    %c2_39 = arith.constant 2 : index
    %149 = memref.load %arg5[%c0_38, %c2_39] : memref<2x16xf32, #tpu.memory_space<smem>>
    %150 = vector.broadcast %149 : f32 to vector<1x16xf32>
    %151 = arith.mulf %150, %141 : vector<1x16xf32>
    %152 = arith.addf %148, %151 : vector<1x16xf32>
    %153 = arith.subf %152, %139 : vector<1x16xf32>
    %c0_40 = arith.constant 0 : index
    %c4_41 = arith.constant 4 : index
    %154 = memref.load %arg5[%c0_40, %c4_41] : memref<2x16xf32, #tpu.memory_space<smem>>
    %155 = vector.broadcast %154 : f32 to vector<1x16xf32>
    %156 = arith.mulf %155, %139 : vector<1x16xf32>
    %c0_42 = arith.constant 0 : index
    %c5_43 = arith.constant 5 : index
    %157 = memref.load %arg5[%c0_42, %c5_43] : memref<2x16xf32, #tpu.memory_space<smem>>
    %158 = vector.broadcast %157 : f32 to vector<1x16xf32>
    %159 = arith.mulf %158, %140 : vector<1x16xf32>
    %160 = arith.addf %156, %159 : vector<1x16xf32>
    %c0_44 = arith.constant 0 : index
    %c6 = arith.constant 6 : index
    %161 = memref.load %arg5[%c0_44, %c6] : memref<2x16xf32, #tpu.memory_space<smem>>
    %162 = vector.broadcast %161 : f32 to vector<1x16xf32>
    %163 = arith.mulf %162, %141 : vector<1x16xf32>
    %164 = arith.addf %160, %163 : vector<1x16xf32>
    %165 = arith.subf %164, %140 : vector<1x16xf32>
    %c0_45 = arith.constant 0 : index
    %c8 = arith.constant 8 : index
    %166 = memref.load %arg5[%c0_45, %c8] : memref<2x16xf32, #tpu.memory_space<smem>>
    %167 = vector.broadcast %166 : f32 to vector<1x16xf32>
    %168 = arith.mulf %167, %139 : vector<1x16xf32>
    %c0_46 = arith.constant 0 : index
    %c9 = arith.constant 9 : index
    %169 = memref.load %arg5[%c0_46, %c9] : memref<2x16xf32, #tpu.memory_space<smem>>
    %170 = vector.broadcast %169 : f32 to vector<1x16xf32>
    %171 = arith.mulf %170, %140 : vector<1x16xf32>
    %172 = arith.addf %168, %171 : vector<1x16xf32>
    %c0_47 = arith.constant 0 : index
    %c10 = arith.constant 10 : index
    %173 = memref.load %arg5[%c0_47, %c10] : memref<2x16xf32, #tpu.memory_space<smem>>
    %174 = vector.broadcast %173 : f32 to vector<1x16xf32>
    %175 = arith.mulf %174, %141 : vector<1x16xf32>
    %176 = arith.addf %172, %175 : vector<1x16xf32>
    %177 = arith.subf %176, %141 : vector<1x16xf32>
    %c0_48 = arith.constant 0 : index
    %c3_49 = arith.constant 3 : index
    %178 = memref.load %arg5[%c0_48, %c3_49] : memref<2x16xf32, #tpu.memory_space<smem>>
    %179 = vector.broadcast %178 : f32 to vector<1x16xf32>
    %180 = arith.addf %153, %179 : vector<1x16xf32>
    %c0_50 = arith.constant 0 : index
    %c7 = arith.constant 7 : index
    %181 = memref.load %arg5[%c0_50, %c7] : memref<2x16xf32, #tpu.memory_space<smem>>
    %182 = vector.broadcast %181 : f32 to vector<1x16xf32>
    %183 = arith.addf %165, %182 : vector<1x16xf32>
    %c0_51 = arith.constant 0 : index
    %c11 = arith.constant 11 : index
    %184 = memref.load %arg5[%c0_51, %c11] : memref<2x16xf32, #tpu.memory_space<smem>>
    %185 = vector.broadcast %184 : f32 to vector<1x16xf32>
    %186 = arith.addf %177, %185 : vector<1x16xf32>
    %187 = arith.mulf %180, %180 : vector<1x16xf32>
    %188 = arith.mulf %183, %183 : vector<1x16xf32>
    %189 = arith.addf %187, %188 : vector<1x16xf32>
    %190 = arith.mulf %186, %186 : vector<1x16xf32>
    %191 = arith.addf %189, %190 : vector<1x16xf32>
    %192 = arith.addf %134, %191 : vector<1x16xf32>
    %c0_52 = arith.constant 0 : index
    %c0_53 = arith.constant 0 : index
    %193 = memref.load %arg6[%c0_52, %c0_53] : memref<2x9xf32, #tpu.memory_space<smem>>
    %194 = vector.broadcast %193 : f32 to vector<1x16xf32>
    %195 = arith.mulf %194, %139 : vector<1x16xf32>
    %c0_54 = arith.constant 0 : index
    %c1_55 = arith.constant 1 : index
    %196 = memref.load %arg6[%c0_54, %c1_55] : memref<2x9xf32, #tpu.memory_space<smem>>
    %197 = vector.broadcast %196 : f32 to vector<1x16xf32>
    %198 = arith.mulf %197, %140 : vector<1x16xf32>
    %199 = arith.addf %195, %198 : vector<1x16xf32>
    %c0_56 = arith.constant 0 : index
    %c2_57 = arith.constant 2 : index
    %200 = memref.load %arg6[%c0_56, %c2_57] : memref<2x9xf32, #tpu.memory_space<smem>>
    %201 = vector.broadcast %200 : f32 to vector<1x16xf32>
    %202 = arith.mulf %201, %141 : vector<1x16xf32>
    %203 = arith.addf %199, %202 : vector<1x16xf32>
    %204 = arith.subf %203, %139 : vector<1x16xf32>
    %c0_58 = arith.constant 0 : index
    %c3_59 = arith.constant 3 : index
    %205 = memref.load %arg6[%c0_58, %c3_59] : memref<2x9xf32, #tpu.memory_space<smem>>
    %206 = vector.broadcast %205 : f32 to vector<1x16xf32>
    %207 = arith.mulf %206, %139 : vector<1x16xf32>
    %c0_60 = arith.constant 0 : index
    %c4_61 = arith.constant 4 : index
    %208 = memref.load %arg6[%c0_60, %c4_61] : memref<2x9xf32, #tpu.memory_space<smem>>
    %209 = vector.broadcast %208 : f32 to vector<1x16xf32>
    %210 = arith.mulf %209, %140 : vector<1x16xf32>
    %211 = arith.addf %207, %210 : vector<1x16xf32>
    %c0_62 = arith.constant 0 : index
    %c5_63 = arith.constant 5 : index
    %212 = memref.load %arg6[%c0_62, %c5_63] : memref<2x9xf32, #tpu.memory_space<smem>>
    %213 = vector.broadcast %212 : f32 to vector<1x16xf32>
    %214 = arith.mulf %213, %141 : vector<1x16xf32>
    %215 = arith.addf %211, %214 : vector<1x16xf32>
    %216 = arith.subf %215, %140 : vector<1x16xf32>
    %c0_64 = arith.constant 0 : index
    %c6_65 = arith.constant 6 : index
    %217 = memref.load %arg6[%c0_64, %c6_65] : memref<2x9xf32, #tpu.memory_space<smem>>
    %218 = vector.broadcast %217 : f32 to vector<1x16xf32>
    %219 = arith.mulf %218, %139 : vector<1x16xf32>
    %c0_66 = arith.constant 0 : index
    %c7_67 = arith.constant 7 : index
    %220 = memref.load %arg6[%c0_66, %c7_67] : memref<2x9xf32, #tpu.memory_space<smem>>
    %221 = vector.broadcast %220 : f32 to vector<1x16xf32>
    %222 = arith.mulf %221, %140 : vector<1x16xf32>
    %223 = arith.addf %219, %222 : vector<1x16xf32>
    %c0_68 = arith.constant 0 : index
    %c8_69 = arith.constant 8 : index
    %224 = memref.load %arg6[%c0_68, %c8_69] : memref<2x9xf32, #tpu.memory_space<smem>>
    %225 = vector.broadcast %224 : f32 to vector<1x16xf32>
    %226 = arith.mulf %225, %141 : vector<1x16xf32>
    %227 = arith.addf %223, %226 : vector<1x16xf32>
    %228 = arith.subf %227, %141 : vector<1x16xf32>
    %229 = arith.mulf %204, %204 : vector<1x16xf32>
    %230 = arith.mulf %216, %216 : vector<1x16xf32>
    %231 = arith.addf %229, %230 : vector<1x16xf32>
    %232 = arith.mulf %228, %228 : vector<1x16xf32>
    %233 = arith.addf %231, %232 : vector<1x16xf32>
    %234 = arith.addf %135, %233 : vector<1x16xf32>
    %c0_70 = arith.constant 0 : index
    %c0_71 = arith.constant 0 : index
    %c0_72 = arith.constant 0 : index
    %235 = vector.load %arg4[%c0_70, %c0_71, %c0_72] : memref<2x32x1xf32, #tpu.memory_space<vmem>>, vector<1x32x1xf32>
    %236 = vector.shape_cast %235 : vector<1x32x1xf32> to vector<32x1xf32>
    %237 = arith.mulf %138, %138 : vector<32x16xf32>
    %cst_73 = arith.constant dense<0.000000e+00> : vector<16xf32>
    %238 = vector.multi_reduction <add>, %237, %cst_73 [0] : vector<32x16xf32> to vector<16xf32>
    %239 = vector.shape_cast %238 : vector<16xf32> to vector<1x16xf32>
    %cst_74 = arith.constant 1.000000e-24 : f32
    %240 = vector.broadcast %cst_74 : f32 to vector<1x16xf32>
    %241 = arith.maximumf %239, %240 : vector<1x16xf32>
    %242 = math.rsqrt %241 : vector<1x16xf32>
    %243 = arith.mulf %236, %236 : vector<32x1xf32>
    %cst_75 = arith.constant dense<0.000000e+00> : vector<1xf32>
    %244 = vector.multi_reduction <add>, %243, %cst_75 [0] : vector<32x1xf32> to vector<1xf32>
    %245 = vector.shape_cast %244 : vector<1xf32> to vector<1x1xf32>
    %cst_76 = arith.constant 1.000000e-24 : f32
    %246 = vector.broadcast %cst_76 : f32 to vector<1x1xf32>
    %247 = arith.maximumf %245, %246 : vector<1x1xf32>
    %248 = math.rsqrt %247 : vector<1x1xf32>
    %249 = vector.broadcast %242 : vector<1x16xf32> to vector<32x16xf32>
    %250 = arith.mulf %138, %249 : vector<32x16xf32>
    %251 = vector.broadcast %248 : vector<1x1xf32> to vector<32x1xf32>
    %252 = arith.mulf %236, %251 : vector<32x1xf32>
    %253 = vector.broadcast %252 : vector<32x1xf32> to vector<32x16xf32>
    %254 = arith.mulf %250, %253 : vector<32x16xf32>
    %cst_77 = arith.constant dense<0.000000e+00> : vector<16xf32>
    %255 = vector.multi_reduction <add>, %254, %cst_77 [0] : vector<32x16xf32> to vector<16xf32>
    %256 = vector.shape_cast %255 : vector<16xf32> to vector<1x16xf32>
    %257 = arith.mulf %256, %256 : vector<1x16xf32>
    %258 = arith.addf %136, %257 : vector<1x16xf32>
    %c1_78 = arith.constant 1 : index
    %c0_79 = arith.constant 0 : index
    %c0_80 = arith.constant 0 : index
    %259 = vector.load %arg3[%c1_78, %c0_79, %c0_80] : memref<2x32x16xf32, #tpu.memory_space<vmem>>, vector<1x32x16xf32>
    %260 = vector.shape_cast %259 : vector<1x32x16xf32> to vector<32x16xf32>
    %261 = vector.extract_strided_slice %260 {offsets = [0, 0], sizes = [1, 16], strides = [1, 1]} : vector<32x16xf32> to vector<1x16xf32>
    %262 = vector.extract_strided_slice %260 {offsets = [1, 0], sizes = [1, 16], strides = [1, 1]} : vector<32x16xf32> to vector<1x16xf32>
    %263 = vector.extract_strided_slice %260 {offsets = [2, 0], sizes = [1, 16], strides = [1, 1]} : vector<32x16xf32> to vector<1x16xf32>
    %c1_81 = arith.constant 1 : index
    %c0_82 = arith.constant 0 : index
    %264 = memref.load %arg5[%c1_81, %c0_82] : memref<2x16xf32, #tpu.memory_space<smem>>
    %265 = vector.broadcast %264 : f32 to vector<1x16xf32>
    %266 = arith.mulf %265, %261 : vector<1x16xf32>
    %c1_83 = arith.constant 1 : index
    %c1_84 = arith.constant 1 : index
    %267 = memref.load %arg5[%c1_83, %c1_84] : memref<2x16xf32, #tpu.memory_space<smem>>
    %268 = vector.broadcast %267 : f32 to vector<1x16xf32>
    %269 = arith.mulf %268, %262 : vector<1x16xf32>
    %270 = arith.addf %266, %269 : vector<1x16xf32>
    %c1_85 = arith.constant 1 : index
    %c2_86 = arith.constant 2 : index
    %271 = memref.load %arg5[%c1_85, %c2_86] : memref<2x16xf32, #tpu.memory_space<smem>>
    %272 = vector.broadcast %271 : f32 to vector<1x16xf32>
    %273 = arith.mulf %272, %263 : vector<1x16xf32>
    %274 = arith.addf %270, %273 : vector<1x16xf32>
    %275 = arith.subf %274, %261 : vector<1x16xf32>
    %c1_87 = arith.constant 1 : index
    %c4_88 = arith.constant 4 : index
    %276 = memref.load %arg5[%c1_87, %c4_88] : memref<2x16xf32, #tpu.memory_space<smem>>
    %277 = vector.broadcast %276 : f32 to vector<1x16xf32>
    %278 = arith.mulf %277, %261 : vector<1x16xf32>
    %c1_89 = arith.constant 1 : index
    %c5_90 = arith.constant 5 : index
    %279 = memref.load %arg5[%c1_89, %c5_90] : memref<2x16xf32, #tpu.memory_space<smem>>
    %280 = vector.broadcast %279 : f32 to vector<1x16xf32>
    %281 = arith.mulf %280, %262 : vector<1x16xf32>
    %282 = arith.addf %278, %281 : vector<1x16xf32>
    %c1_91 = arith.constant 1 : index
    %c6_92 = arith.constant 6 : index
    %283 = memref.load %arg5[%c1_91, %c6_92] : memref<2x16xf32, #tpu.memory_space<smem>>
    %284 = vector.broadcast %283 : f32 to vector<1x16xf32>
    %285 = arith.mulf %284, %263 : vector<1x16xf32>
    %286 = arith.addf %282, %285 : vector<1x16xf32>
    %287 = arith.subf %286, %262 : vector<1x16xf32>
    %c1_93 = arith.constant 1 : index
    %c8_94 = arith.constant 8 : index
    %288 = memref.load %arg5[%c1_93, %c8_94] : memref<2x16xf32, #tpu.memory_space<smem>>
    %289 = vector.broadcast %288 : f32 to vector<1x16xf32>
    %290 = arith.mulf %289, %261 : vector<1x16xf32>
    %c1_95 = arith.constant 1 : index
    %c9_96 = arith.constant 9 : index
    %291 = memref.load %arg5[%c1_95, %c9_96] : memref<2x16xf32, #tpu.memory_space<smem>>
    %292 = vector.broadcast %291 : f32 to vector<1x16xf32>
    %293 = arith.mulf %292, %262 : vector<1x16xf32>
    %294 = arith.addf %290, %293 : vector<1x16xf32>
    %c1_97 = arith.constant 1 : index
    %c10_98 = arith.constant 10 : index
    %295 = memref.load %arg5[%c1_97, %c10_98] : memref<2x16xf32, #tpu.memory_space<smem>>
    %296 = vector.broadcast %295 : f32 to vector<1x16xf32>
    %297 = arith.mulf %296, %263 : vector<1x16xf32>
    %298 = arith.addf %294, %297 : vector<1x16xf32>
    %299 = arith.subf %298, %263 : vector<1x16xf32>
    %c1_99 = arith.constant 1 : index
    %c3_100 = arith.constant 3 : index
    %300 = memref.load %arg5[%c1_99, %c3_100] : memref<2x16xf32, #tpu.memory_space<smem>>
    %301 = vector.broadcast %300 : f32 to vector<1x16xf32>
    %302 = arith.addf %275, %301 : vector<1x16xf32>
    %c1_101 = arith.constant 1 : index
    %c7_102 = arith.constant 7 : index
    %303 = memref.load %arg5[%c1_101, %c7_102] : memref<2x16xf32, #tpu.memory_space<smem>>
    %304 = vector.broadcast %303 : f32 to vector<1x16xf32>
    %305 = arith.addf %287, %304 : vector<1x16xf32>
    %c1_103 = arith.constant 1 : index
    %c11_104 = arith.constant 11 : index
    %306 = memref.load %arg5[%c1_103, %c11_104] : memref<2x16xf32, #tpu.memory_space<smem>>
    %307 = vector.broadcast %306 : f32 to vector<1x16xf32>
    %308 = arith.addf %299, %307 : vector<1x16xf32>
    %309 = arith.mulf %302, %302 : vector<1x16xf32>
    %310 = arith.mulf %305, %305 : vector<1x16xf32>
    %311 = arith.addf %309, %310 : vector<1x16xf32>
    %312 = arith.mulf %308, %308 : vector<1x16xf32>
    %313 = arith.addf %311, %312 : vector<1x16xf32>
    %314 = arith.addf %192, %313 : vector<1x16xf32>
    %c1_105 = arith.constant 1 : index
    %c0_106 = arith.constant 0 : index
    %315 = memref.load %arg6[%c1_105, %c0_106] : memref<2x9xf32, #tpu.memory_space<smem>>
    %316 = vector.broadcast %315 : f32 to vector<1x16xf32>
    %317 = arith.mulf %316, %261 : vector<1x16xf32>
    %c1_107 = arith.constant 1 : index
    %c1_108 = arith.constant 1 : index
    %318 = memref.load %arg6[%c1_107, %c1_108] : memref<2x9xf32, #tpu.memory_space<smem>>
    %319 = vector.broadcast %318 : f32 to vector<1x16xf32>
    %320 = arith.mulf %319, %262 : vector<1x16xf32>
    %321 = arith.addf %317, %320 : vector<1x16xf32>
    %c1_109 = arith.constant 1 : index
    %c2_110 = arith.constant 2 : index
    %322 = memref.load %arg6[%c1_109, %c2_110] : memref<2x9xf32, #tpu.memory_space<smem>>
    %323 = vector.broadcast %322 : f32 to vector<1x16xf32>
    %324 = arith.mulf %323, %263 : vector<1x16xf32>
    %325 = arith.addf %321, %324 : vector<1x16xf32>
    %326 = arith.subf %325, %261 : vector<1x16xf32>
    %c1_111 = arith.constant 1 : index
    %c3_112 = arith.constant 3 : index
    %327 = memref.load %arg6[%c1_111, %c3_112] : memref<2x9xf32, #tpu.memory_space<smem>>
    %328 = vector.broadcast %327 : f32 to vector<1x16xf32>
    %329 = arith.mulf %328, %261 : vector<1x16xf32>
    %c1_113 = arith.constant 1 : index
    %c4_114 = arith.constant 4 : index
    %330 = memref.load %arg6[%c1_113, %c4_114] : memref<2x9xf32, #tpu.memory_space<smem>>
    %331 = vector.broadcast %330 : f32 to vector<1x16xf32>
    %332 = arith.mulf %331, %262 : vector<1x16xf32>
    %333 = arith.addf %329, %332 : vector<1x16xf32>
    %c1_115 = arith.constant 1 : index
    %c5_116 = arith.constant 5 : index
    %334 = memref.load %arg6[%c1_115, %c5_116] : memref<2x9xf32, #tpu.memory_space<smem>>
    %335 = vector.broadcast %334 : f32 to vector<1x16xf32>
    %336 = arith.mulf %335, %263 : vector<1x16xf32>
    %337 = arith.addf %333, %336 : vector<1x16xf32>
    %338 = arith.subf %337, %262 : vector<1x16xf32>
    %c1_117 = arith.constant 1 : index
    %c6_118 = arith.constant 6 : index
    %339 = memref.load %arg6[%c1_117, %c6_118] : memref<2x9xf32, #tpu.memory_space<smem>>
    %340 = vector.broadcast %339 : f32 to vector<1x16xf32>
    %341 = arith.mulf %340, %261 : vector<1x16xf32>
    %c1_119 = arith.constant 1 : index
    %c7_120 = arith.constant 7 : index
    %342 = memref.load %arg6[%c1_119, %c7_120] : memref<2x9xf32, #tpu.memory_space<smem>>
    %343 = vector.broadcast %342 : f32 to vector<1x16xf32>
    %344 = arith.mulf %343, %262 : vector<1x16xf32>
    %345 = arith.addf %341, %344 : vector<1x16xf32>
    %c1_121 = arith.constant 1 : index
    %c8_122 = arith.constant 8 : index
    %346 = memref.load %arg6[%c1_121, %c8_122] : memref<2x9xf32, #tpu.memory_space<smem>>
    %347 = vector.broadcast %346 : f32 to vector<1x16xf32>
    %348 = arith.mulf %347, %263 : vector<1x16xf32>
    %349 = arith.addf %345, %348 : vector<1x16xf32>
    %350 = arith.subf %349, %263 : vector<1x16xf32>
    %351 = arith.mulf %326, %326 : vector<1x16xf32>
    %352 = arith.mulf %338, %338 : vector<1x16xf32>
    %353 = arith.addf %351, %352 : vector<1x16xf32>
    %354 = arith.mulf %350, %350 : vector<1x16xf32>
    %355 = arith.addf %353, %354 : vector<1x16xf32>
    %356 = arith.addf %234, %355 : vector<1x16xf32>
    %c1_123 = arith.constant 1 : index
    %c0_124 = arith.constant 0 : index
    %c0_125 = arith.constant 0 : index
    %357 = vector.load %arg4[%c1_123, %c0_124, %c0_125] : memref<2x32x1xf32, #tpu.memory_space<vmem>>, vector<1x32x1xf32>
    %358 = vector.shape_cast %357 : vector<1x32x1xf32> to vector<32x1xf32>
    %359 = arith.mulf %260, %260 : vector<32x16xf32>
    %cst_126 = arith.constant dense<0.000000e+00> : vector<16xf32>
    %360 = vector.multi_reduction <add>, %359, %cst_126 [0] : vector<32x16xf32> to vector<16xf32>
    %361 = vector.shape_cast %360 : vector<16xf32> to vector<1x16xf32>
    %cst_127 = arith.constant 1.000000e-24 : f32
    %362 = vector.broadcast %cst_127 : f32 to vector<1x16xf32>
    %363 = arith.maximumf %361, %362 : vector<1x16xf32>
    %364 = math.rsqrt %363 : vector<1x16xf32>
    %365 = arith.mulf %358, %358 : vector<32x1xf32>
    %cst_128 = arith.constant dense<0.000000e+00> : vector<1xf32>
    %366 = vector.multi_reduction <add>, %365, %cst_128 [0] : vector<32x1xf32> to vector<1xf32>
    %367 = vector.shape_cast %366 : vector<1xf32> to vector<1x1xf32>
    %cst_129 = arith.constant 1.000000e-24 : f32
    %368 = vector.broadcast %cst_129 : f32 to vector<1x1xf32>
    %369 = arith.maximumf %367, %368 : vector<1x1xf32>
    %370 = math.rsqrt %369 : vector<1x1xf32>
    %371 = vector.broadcast %364 : vector<1x16xf32> to vector<32x16xf32>
    %372 = arith.mulf %260, %371 : vector<32x16xf32>
    %373 = vector.broadcast %370 : vector<1x1xf32> to vector<32x1xf32>
    %374 = arith.mulf %358, %373 : vector<32x1xf32>
    %375 = vector.broadcast %374 : vector<32x1xf32> to vector<32x16xf32>
    %376 = arith.mulf %372, %375 : vector<32x16xf32>
    %cst_130 = arith.constant dense<0.000000e+00> : vector<16xf32>
    %377 = vector.multi_reduction <add>, %376, %cst_130 [0] : vector<32x16xf32> to vector<16xf32>
    %378 = vector.shape_cast %377 : vector<16xf32> to vector<1x16xf32>
    %379 = arith.mulf %378, %378 : vector<1x16xf32>
    %380 = arith.addf %258, %379 : vector<1x16xf32>
    %cst_131 = arith.constant dense<0.000000e+00> : vector<1xf32>
    %381 = vector.multi_reduction <add>, %380, %cst_131 [1] : vector<1x16xf32> to vector<1xf32>
    %382 = vector.shape_cast %381 : vector<1xf32> to vector<1x1xf32>
    %cst_132 = arith.constant 3.125000e-02 : f32
    %383 = vector.broadcast %cst_132 : f32 to vector<1x1xf32>
    %384 = arith.mulf %382, %383 : vector<1x1xf32>
    %cst_133 = arith.constant 1.000000e-01 : f32
    %385 = vector.broadcast %cst_133 : f32 to vector<1x1xf32>
    %386 = arith.mulf %385, %384 : vector<1x1xf32>
    %387 = arith.addf %133, %386 : vector<1x1xf32>
    %388 = tpu.iota {dimensions = array<i32: 1>} : vector<1x128xi32>
    %c0_i32 = arith.constant 0 : i32
    %389 = vector.broadcast %c0_i32 : i32 to vector<1x128xi32>
    %390 = arith.cmpi eq, %388, %389 : vector<1x128xi32>
    %cst_134 = arith.constant 0.000000e+00 : f32
    %391 = vector.broadcast %cst_134 : f32 to vector<1x128xf32>
    %392 = vector.shape_cast %133 : vector<1x1xf32> to vector<1x1xf32>
    %393 = vector.broadcast %392 : vector<1x1xf32> to vector<1x128xf32>
    %394 = arith.select %390, %393, %391 : vector<1x128xi1>, vector<1x128xf32>
    %cst_135 = arith.constant dense<0.000000e+00> : vector<1xf32>
    %395 = vector.multi_reduction <add>, %314, %cst_135 [1] : vector<1x16xf32> to vector<1xf32>
    %396 = vector.shape_cast %395 : vector<1xf32> to vector<1x1xf32>
    %cst_136 = arith.constant 0.010416667 : f32
    %397 = vector.broadcast %cst_136 : f32 to vector<1x1xf32>
    %398 = arith.mulf %396, %397 : vector<1x1xf32>
    %cst_137 = arith.constant 1.000000e-01 : f32
    %399 = vector.broadcast %cst_137 : f32 to vector<1x1xf32>
    %400 = arith.mulf %399, %398 : vector<1x1xf32>
    %401 = arith.addf %387, %400 : vector<1x1xf32>
    %c1_i32 = arith.constant 1 : i32
    %402 = vector.broadcast %c1_i32 : i32 to vector<1x128xi32>
    %403 = arith.cmpi eq, %388, %402 : vector<1x128xi32>
    %404 = vector.shape_cast %398 : vector<1x1xf32> to vector<1x1xf32>
    %405 = vector.broadcast %404 : vector<1x1xf32> to vector<1x128xf32>
    %406 = arith.select %403, %405, %394 : vector<1x128xi1>, vector<1x128xf32>
    %cst_138 = arith.constant dense<0.000000e+00> : vector<1xf32>
    %407 = vector.multi_reduction <add>, %356, %cst_138 [1] : vector<1x16xf32> to vector<1xf32>
    %408 = vector.shape_cast %407 : vector<1xf32> to vector<1x1xf32>
    %cst_139 = arith.constant 0.010416667 : f32
    %409 = vector.broadcast %cst_139 : f32 to vector<1x1xf32>
    %410 = arith.mulf %408, %409 : vector<1x1xf32>
    %cst_140 = arith.constant 1.000000e-01 : f32
    %411 = vector.broadcast %cst_140 : f32 to vector<1x1xf32>
    %412 = arith.mulf %411, %410 : vector<1x1xf32>
    %413 = arith.addf %401, %412 : vector<1x1xf32>
    %c2_i32 = arith.constant 2 : i32
    %414 = vector.broadcast %c2_i32 : i32 to vector<1x128xi32>
    %415 = arith.cmpi eq, %388, %414 : vector<1x128xi32>
    %416 = vector.shape_cast %410 : vector<1x1xf32> to vector<1x1xf32>
    %417 = vector.broadcast %416 : vector<1x1xf32> to vector<1x128xf32>
    %418 = arith.select %415, %417, %406 : vector<1x128xi1>, vector<1x128xf32>
    %c3_i32 = arith.constant 3 : i32
    %419 = vector.broadcast %c3_i32 : i32 to vector<1x128xi32>
    %420 = arith.cmpi eq, %388, %419 : vector<1x128xi32>
    %421 = vector.shape_cast %384 : vector<1x1xf32> to vector<1x1xf32>
    %422 = vector.broadcast %421 : vector<1x1xf32> to vector<1x128xf32>
    %423 = arith.select %420, %422, %418 : vector<1x128xi1>, vector<1x128xf32>
    %c4_i32 = arith.constant 4 : i32
    %424 = vector.broadcast %c4_i32 : i32 to vector<1x128xi32>
    %425 = arith.cmpi eq, %388, %424 : vector<1x128xi32>
    %426 = vector.shape_cast %413 : vector<1x1xf32> to vector<1x1xf32>
    %427 = vector.broadcast %426 : vector<1x1xf32> to vector<1x128xf32>
    %428 = arith.select %425, %427, %423 : vector<1x128xi1>, vector<1x128xf32>
    %c0_141 = arith.constant 0 : index
    %c0_142 = arith.constant 0 : index
    %429 = vector.load %arg7[%c0_141, %c0_142] : memref<1x128xf32, #tpu.memory_space<vmem>>, vector<1x128xf32>
    tpu.vector_store %arg7[%c0_141, %c0_142], %428 {strides = array<i32>} : memref<1x128xf32, #tpu.memory_space<vmem>>, vector<1x128xf32>,
    return
  }
}

</mosaic_0001>

<bundles_post_ra>
// kernel: tpu_custom_call.1
= control target key start
LH: loop header
LB: loop body
LE: loop exit
PB: predicated region body
PF: predicated region fallthrough
CT: control target
= control target key end

     0   :  { %12 = vsyncpa [#allocation4], 0  ;;  %s1277_s0 = inlined_call_operand.vmem [shape: f32[4], index: 0, kind: input, shape index: {}]   ;;  %s1278_s1 = inlined_call_operand.vmem [shape: f32[3], index: 1, kind: input, shape index: {}]   ;;  %s1279_s2 = inlined_call_operand.vmem [shape: f32[8,16], index: 2, kind: input, shape index: {}]   ;;  %s1280_s3 = inlined_call_operand.vmem [shape: f32[2,32,16], index: 3, kind: input, shape index: {}]   ;;  %s1281_s4 = inlined_call_operand.vmem [shape: f32[2,32,1], index: 4, kind: input, shape index: {}]   ;;  %s1282_s5 = inlined_call_operand.vmem [shape: f32[2,16], index: 5, kind: input, shape index: {}]   ;;  %s1283_s6 = inlined_call_operand.vmem [shape: f32[2,9], index: 6, kind: input, shape index: {}]   ;;  %s1284_s7 = inlined_call_operand.hbm [shape: f32[1,128], index: 7, kind: output, shape index: {}]  }
   0x1   :  { %13 = vsyncpa [#allocation6], 0 }
   0x2   :  { %14 = vsyncpa [#allocation9], 0  ;;  %s32_s26 = sshll.u32 %s1278_s1, 4  ;;  %s33_s26 = int_to_ptr.vmem [resolvable:$true] %s32_s26 }
   0x3   :  { %15 = vsyncpa [#allocation3], 0  ;;  %s22_s29 = sshll.u32 %s1277_s0, 4  ;;  %s768_s30 = scalar_lea.vmem %s33_s26, 16  ;;  %s23_s29 = int_to_ptr.vmem [resolvable:$true] %s22_s29 }
   0x4   :  { %p769_p0 = scmp.ne.s32.totalorder %s33_s26, %s768_s30  ;;  %p773_p1 = scmp.lt.s32.totalorder %s33_s26, %s33_s26 }
   0x5   :  { %p774_p2 = scmp.lt.s32.totalorder %s768_s30, %s768_s30 }
   0x7   :  { %p775_p3 = por %p774_p2, %p773_p1 }
   0x9   :  { %p776_p4 = pnand %p775_p3, %p769_p0 }
   0xb   :  { %779 = shalt.err (!%p776_p4)
}
   0xc   :  { %s846_s8 = smov [#allocation5]   ;;  %s780_s9 = scalar_lea.vmem %s23_s29, 16 }
   0xd   :  { %35 = dma.vmem_to_smem %s33_s26, 16, %s846_s8, [#allocation6]  }
   0xe   :  { %p781_p5 = scmp.ne.s32.totalorder %s23_s29, %s780_s9  ;;  %p785_p6 = scmp.lt.s32.totalorder %s23_s29, %s23_s29 }
   0xf   :  { %p786_p7 = scmp.lt.s32.totalorder %s780_s9, %s780_s9 }
  0x11   :  { %p787_p8 = por %p786_p7, %p785_p6 }
  0x13   :  { %p788_p9 = pnand %p787_p8, %p781_p5 }
  0x15   :  { %791 = shalt.err (!%p788_p9)
}
  0x16   :  { %s847_s1 = smov [#allocation2]   ;;  %s48_s11 = sshll.u32 %s1282_s5, 4  ;;  %s49_s11 = int_to_ptr.vmem [resolvable:$true] %s48_s11 }
  0x17   :  { %25 = dma.vmem_to_smem %s23_s29, 16, %s847_s1, [#allocation4]  }
  0x18   :  { %s58_s14 = sshll.u32 %s1283_s6, 4  ;;  %s792_s15 = scalar_lea.vmem %s49_s11, 32  ;;  %s59_s14 = int_to_ptr.vmem [resolvable:$true] %s58_s14 }
  0x19   :  { %p793_p10 = scmp.ne.s32.totalorder %s49_s11, %s792_s15  ;;  %p797_p11 = scmp.lt.s32.totalorder %s49_s11, %s49_s11 }
  0x1a   :  { %p798_p12 = scmp.lt.s32.totalorder %s792_s15, %s792_s15 }
  0x1c   :  { %p799_p13 = por %p798_p12, %p797_p11 }
  0x1e   :  { %p800_p0 = pnand %p799_p13, %p793_p10 }
  0x20   :  { %803 = shalt.err (!%p800_p0)
}
  0x21   :  { %s848_s16 = smov [#allocation7]   ;;  %s804_s17 = scalar_lea.vmem %s59_s14, 32 }
  0x22   :  { %51 = dma.vmem_to_smem %s49_s11, 32, %s848_s16, [#allocation6]  }
  0x23   :  { %p805_p1 = scmp.ne.s32.totalorder %s59_s14, %s804_s17  ;;  %p809_p2 = scmp.lt.s32.totalorder %s59_s14, %s59_s14 }
  0x24   :  { %p810_p3 = scmp.lt.s32.totalorder %s804_s17, %s804_s17 }
  0x26   :  { %p811_p4 = por %p810_p3, %p809_p2 }
  0x28   :  { %p812_p5 = pnand %p811_p4, %p805_p1 }
  0x2a   :  { %815 = shalt.err (!%p812_p5)
}
  0x2b   :  { %s849_s5 = smov [#allocation8]  }
  0x2c   :  { %61 = dma.vmem_to_smem %s59_s14, 32, %s849_s5, [#allocation9]  }
  0x2d   :  { %838 = dma.done.wait [#allocation4], 16  }
  0x2e   :  { %839 = vsyncadd [#allocation4], 4294967280 }
  0x2f   :  { %840 = dma.done.wait [#allocation6], 48  }
  0x30   :  { %841 = vsyncadd [#allocation6], 4294967248 }
  0x31   :  { %842 = dma.done.wait [#allocation9], 32  }
  0x32   :  { %843 = vsyncadd [#allocation9], 4294967264 }
  0x33   :  { %74 = sfence }
  0x34   :  { %vm353_vm0 = vcmask 7168   ;;  %v907_v0 = vld [vmem:[%s1281_s4 + $0x20] sm:$0xff]  ;;  %v912_v1 = vld [vmem:[%s1281_s4 + $0x28] sm:$0xff]  ;;  %v917_v2 = vld [vmem:[%s1281_s4 + $0x30] sm:$0xff]  ;;  %v850_v3 = vmov 0   ;;  %s75_s1 = sld [smem:[#allocation2]] }
  0x35   :  { %753 = vset.pattern.permute.xlu1 %v850_v3  ;;  %752 = vset.pattern.permute.xlu0 %v850_v3  ;;  %v922_v4 = vld [vmem:[%s1281_s4 + $0x38] sm:$0xff]  ;;  %v579_v5 = vmul.f32 %v907_v0, %v907_v0  ;;  %v580_v6 = vmul.f32 %v912_v1, %v912_v1  ;;  %v581_v7 = vmul.f32 %v917_v2, %v917_v2  ;;  %v933_v8 = vld [vmem:[%s1281_s4] sm:$0xff]  ;;  %v938_v9 = vld [vmem:[%s1281_s4 + $0x8] sm:$0xff]  ;;  %s694_s0 = sld [smem:[#allocation2 + $0x2]]  ;;  %s695_s10 = sld [smem:[#allocation2 + $0x3]]  ;;  %vm181_vm4 = vcmask 122880  }
  0x36   :  { %v582_v10 = vmul.f32 %v922_v4, %v922_v4  ;;  %v945_v11 = vld [vmem:[%s1281_s4 + $0x10] sm:$0xff]  ;;  %v950_v12 = vld [vmem:[%s1281_s4 + $0x18] sm:$0xff]  ;;  %v349_v13 = vmul.f32 %v933_v8, %v933_v8  ;;  %v350_v14 = vmul.f32 %v938_v9, %v938_v9  ;;  %s693_s4 = sld [smem:[#allocation2 + $0x1]]  ;;  %s971_s11 = sld [smem:[#allocation5]]  ;;  %vm333_vm6 = vcmask 130048  }
  0x37   :  { %v583_v15 = vsel %vm353_vm0, %v579_v5, 0.0  ;;  %v584_v16 = vsel %vm353_vm0, %v580_v6, 0.0  ;;  %v586_v17 = vsel %vm353_vm0, %v581_v7, 0.0  ;;  %v351_v18 = vmul.f32 %v945_v11, %v945_v11  ;;  %s974_s12 = sld [smem:[#allocation5 + $0x1]]  ;;  %s976_s13 = sld [smem:[#allocation5 + $0x2]] }
  0x38   :  { %v585_v19 = vadd.f32 %v584_v16, %v583_v15  ;;  %v352_v20 = vmul.f32 %v950_v12, %v950_v12  ;;  %v354_v21 = vsel %vm353_vm0, %v349_v13, 0.0  ;;  %v588_v22 = vsel %vm353_vm0, %v582_v10, 0.0  ;;  %s978_s14 = sld [smem:[#allocation7 + $0x1]]  ;;  %s980_s15 = sld [smem:[#allocation7 + $0x5]] }
  0x39   :  { %v355_v23 = vsel %vm353_vm0, %v350_v14, 0.0  ;;  %v357_v24 = vsel %vm353_vm0, %v351_v18, 0.0  ;;  %s983_s16 = sld [smem:[#allocation7 + $0x81]]  ;;  %s985_s17 = sld [smem:[#allocation7 + $0x85]] }
  0x3a   :  { %v587_v25 = vadd.f32 %v586_v17, %v585_v19  ;;  %v356_v26 = vadd.f32 %v355_v23, %v354_v21  ;;  %v359_v27 = vsel %vm353_vm0, %v352_v20, 0.0  ;;  %v76_v32 = vstv %s75_s1  ;;  %s987_s5 = sld [smem:[#allocation7]]  ;;  %s989_s6 = sld [smem:[#allocation7 + $0x2]] }
  0x3b   :  { %v80_v36 = vstv %s694_s0  ;;  %v82_v39 = vstv %s695_s10  ;;  %v83_v40 = vmul.f32 %v76_v32, %v76_v32  ;;  %s992_s18 = sld [smem:[#allocation7 + $0x4]]  ;;  %s994_s19 = sld [smem:[#allocation7 + $0x6]] }
  0x3c   :  { %v589_v28 = vadd.f32 %v588_v22, %v587_v25  ;;  %v358_v29 = vadd.f32 %v357_v24, %v356_v26  ;;  %v78_v35 = vstv %s693_s4  ;;  %v86_v42 = vmul.f32 %v80_v36, %v80_v36  ;;  %s996_s20 = sld [smem:[#allocation7 + $0x8]]  ;;  %s998_s21 = sld [smem:[#allocation7 + $0x9]] }
  0x3d   :  { %v84_v41 = vmul.f32 %v78_v35, %v78_v35  ;;  %v88_v46 = vmul.f32 %v82_v39, %v82_v39  ;;  %v104_v61 = vmul.f32 %v80_v36, %v78_v35  ;;  %v105_v62 = vmul.f32 %v82_v39, %v76_v32  ;;  %s1001_s22 = sld [smem:[#allocation7 + $0xa]]  ;;  %s1049_s1 = sld [smem:[#allocation7 + $0x3]] }
  0x3e   :  { %v590_v30 = vrot.slane %v589_v28, 4  ;;  %v360_v31 = vadd.f32 %v359_v27, %v358_v29  ;;  %v109_v5 = vmul.f32 %v80_v36, %v76_v32  ;;  %v110_v6 = vmul.f32 %v82_v39, %v78_v35  ;;  %s1051_s4 = sld [smem:[#allocation7 + $0x7]]  ;;  %s1053_s0 = sld [smem:[#allocation7 + $0xb]] }
  0x3f   :  { %v85_v45 = vadd.f32 %v84_v41, %v83_v40  ;;  %v121_v13 = vmul.f32 %v82_v39, %v80_v36  ;;  %v122_v14 = vmul.f32 %v78_v35, %v76_v32  ;;  %v100_v16 = vadd.f32 %v88_v46, %v86_v42  ;;  %s1055_s10 = sld [smem:[#allocation7 + $0x80]]  ;;  %s1093_s23 = sld [smem:[#allocation7 + $0x8a]] }
  0x40   :  { %v591_v33 = vadd.f32 %v590_v30, %v589_v28  ;;  %v361_v34 = vrot.slane %v360_v31, 4  ;;  %v106_v18 = vsub.f32 %v104_v61, %v105_v62  ;;  %v114_v19 = vadd.f32 %v105_v62, %v104_v61  ;;  %v137_v62 = vld [vmem:[%s1279_s2 + $0x1] sm:$0x1]  ;;  %s1110_s24 = sld [smem:[#allocation8 + $0x1]]  ;;  %s1112_s25 = sld [smem:[#allocation8 + $0x2]] }
  0x41   :  { %v87_v49 = vadd.f32 %v86_v42, %v85_v45  ;;  %v111_v20 = vadd.f32 %v110_v6, %v109_v5  ;;  %v126_v21 = vsub.f32 %v110_v6, %v109_v5  ;;  %v123_v23 = vsub.f32 %v121_v13, %v122_v14  ;;  %s1116_s26 = sld [smem:[#allocation8 + $0x3]]  ;;  %s1118_s27 = sld [smem:[#allocation8 + $0x4]] }
  0x42   :  { %v592_v37 = vrot.slane %v591_v33, 2  ;;  %v362_v38 = vadd.f32 %v361_v34, %v360_v31  ;;  %v101_v24 = vmul.f32 2.0, %v100_v16  ;;  %v132_v25 = vadd.f32 %v86_v42, %v84_v41  ;;  %v1007_v34 = vld [vmem:[%s1280_s3] sm:$0xff]  ;;  %s1127_s28 = sld [smem:[#allocation8 + $0x5]]  ;;  %s1135_s29 = sld [smem:[#allocation8 + $0x6]] }
  0x43   :  { %v89_v52 = vadd.f32 %v88_v46, %v87_v49  ;;  %v107_v27 = vmul.f32 2.0, %v106_v18  ;;  %v115_v28 = vmul.f32 2.0, %v114_v19  ;;  %v124_v30 = vmul.f32 2.0, %v123_v23  ;;  %v136_v16 = vld [vmem:[%s1279_s2] sm:$0x1]  ;;  %s1137_s30 = sld [smem:[#allocation8 + $0x7]] }
  0x44   :  { %v593_v43 = vadd.f32 %v592_v37, %v591_v33  ;;  %v363_v44 = vrot.slane %v362_v38, 2  ;;  %v127_v31 = vmul.f32 2.0, %v126_v21  ;;  %v133_v35 = vmul.f32 2.0, %v132_v25  ;;  %v1014_v37 = vld [vmem:[%s1280_s3 + $0x20] sm:$0xff]  ;;  %s1145_s8 = sld [smem:[#allocation8 + $0x8]] }
  0x45   :  { %754 = vrsqrt.f32 %v89_v52  ;;  %vm92_vm1 = vcmp.eq.f32.partialorder %v89_v52, inf  ;;  %v95_v59 = vand.u32 2147483648, %v89_v52  ;;  %vm94_vm2 = vcmp.eq.f32.partialorder %v89_v52, 0.0  ;;  %s1154_s9 = sld [smem:[#allocation8 + $0x80]] }
  0x46   :  { %v594_v47 = vrot.slane %v593_v43, 1  ;;  %v364_v48 = vadd.f32 %v363_v44, %v362_v38  ;;  %v195_v36 = vstv %s978_s14  ;;  %v148_v38 = vstv %s971_s11  ;;  %s1058_s14 = sld [smem:[#allocation7 + $0x82]]  ;;  %s1102_s11 = sld [smem:[#allocation8]] }
  0x47   :  { %v425_v40 = vstv %s983_s16  ;;  %v166_v42 = vstv %s976_s13  ;;  %v202_v44 = vstv %s989_s6  ;;  %v227_v6 = vrot.slane %v1007_v34, 1  ;;  %s1107_s13 = sld [smem:[#allocation7 + $0x8b]]  ;;  %s1187_s16 = sld [smem:[#allocation8 + $0x87]] }
  0x48   :  { %v595_v50 = vadd.f32 %v594_v47, %v593_v43  ;;  %v365_v51 = vrot.slane %v364_v48, 1  ;;  %v192_v43 = vstv %s987_s5  ;;  %v1026_v47 = vmul.f32 %v1014_v37, %v425_v40  ;;  %v139_v40 = vld [vmem:[%s1279_s2 + $0x3] sm:$0x1] }
  0x49   :  { %v193_v45 = vmul.f32 %v192_v43, %v1007_v34  ;;  %v203_v49 = vmul.f32 %v202_v44, %v1007_v34 }
  0x4a   :  { %v596_v53 = vmax.f32 %v595_v50, 1e-24  ;;  %v366_v54 = vadd.f32 %v365_v51, %v364_v48  ;;  %v443_v48 = vstv %s985_s17  ;;  %v210_v50 = vstv %s992_s18  ;;  %s1076_s18 = sld [smem:[#allocation7 + $0x86]]  ;;  %s1189_s17 = sld [smem:[#allocation8 + $0x88]] }
  0x4c   :  { %756 = vrsqrt.f32 %v596_v53  ;;  %v367_v55 = vmax.f32 %v366_v54, 1e-24  ;;  %v211_v54 = vmul.f32 %v210_v50, %v1007_v34  ;;  %v251_v50 = vstv %s1049_s1  ;;  %s1156_s1 = sld [smem:[#allocation8 + $0x81]] }
  0x4e   :  { %758 = vrsqrt.f32 %v367_v55 }
  0x4f   :  { %v755_v56 = vpop.eup %754 }
  0x50   :  { %v91_v58 = vmul.f32 %v755_v56, %v89_v52  ;;  %v231_v56 = vstv %s996_s20 }
  0x52   :  { %v93_v3 = vsel %vm92_vm1, %v89_v52, %v91_v58  ;;  %v220_v52 = vstv %s994_s19  ;;  %v232_v58 = vmul.f32 %v231_v56, %v1007_v34  ;;  %s1078_s19 = sld [smem:[#allocation7 + $0x88]] }
  0x53   :  { %v96_v15 = vsel %vm94_vm2, %v95_v59, %v93_v3  ;;  %v221_v55 = vmul.f32 %v220_v52, %v1007_v34  ;;  %v234_v59 = vstv %s998_s21  ;;  %v257_v52 = vstv %s1053_s0  ;;  %s1171_s0 = sld [smem:[#allocation8 + $0x83]] }
  0x54   :  { %v97_v17 = vadd.f32 1e-08, %v96_v15 }
  0x55   :  { %v223_v5 = vrot.slane %v221_v55, 2 }
  0x56   :  { %v757_v57 = vpop.eup %756  ;;  %v98_v22 = vmul.f32 %v97_v17, %v97_v17 }
  0x57   :  { %v602_v60 = vmul.f32 %v757_v57, %v907_v0  ;;  %v603_v10 = vmul.f32 %v757_v57, %v912_v1  ;;  %v604_v1 = vmul.f32 %v757_v57, %v917_v2  ;;  %v112_v2 = vmul.f32 2.0, %v111_v20 }
  0x58   :  { %v759_v63 = vpop.eup %758  ;;  %760 = vrcp.f32 %v98_v22 }
  0x59   :  { %608 = vperm.xlu1 %753, %v602_v60   ;;  %v373_v7 = vmul.f32 %v759_v63, %v933_v8  ;;  %v374_v0 = vmul.f32 %v759_v63, %v938_v9  ;;  %v117_v8 = vadd.f32 %v88_v46, %v84_v41  ;;  %v129_v9 = vadd.f32 %v122_v14, %v121_v13 }
  0x5a   :  { %v375_v26 = vmul.f32 %v759_v63, %v945_v11  ;;  %v605_v11 = vmul.f32 %v757_v57, %v922_v4  ;;  %v376_v33 = vmul.f32 %v759_v63, %v950_v12  ;;  %v213_v4 = vstv %s980_s15  ;;  %v138_v63 = vld [vmem:[%s1279_s2 + $0x2] sm:$0x1]  ;;  %s1064_s15 = sld [smem:[#allocation7 + $0x84]] }
  0x5b   :  { %379 = vperm.xlu0 %752, %v373_v7   ;;  %v118_v29 = vmul.f32 2.0, %v117_v8  ;;  %v130_v32 = vmul.f32 2.0, %v129_v9  ;;  %v196_v12 = vmul.f32 %v195_v36, %v1007_v34  ;;  %v214_v39 = vmul.f32 %v213_v4, %v1007_v34 }
  0x5c   :  { %v157_v41 = vstv %s974_s12  ;;  %v205_v57 = vrot.slane %v203_v49, 2  ;;  %v241_v60 = vstv %s1001_s22  ;;  %v235_v7 = vmul.f32 %v234_v59, %v1007_v34  ;;  %s1091_s22 = sld [smem:[#allocation7 + $0x89]]  ;;  %s1105_s12 = sld [smem:[#allocation7 + $0x87]] }
  0x5d   :  { %613 = vperm.xlu1 %753, %v603_v10   ;;  %v198_v46 = vrot.slane %v196_v12, 1  ;;  %v216_v51 = vrot.slane %v214_v39, 1 }
  0x5f   :  { %384 = vperm.xlu0 %752, %v374_v0   ;;  %v200_v53 = vadd.f32 %v198_v46, %v193_v45  ;;  %v218_v3 = vadd.f32 %v216_v51, %v211_v54  ;;  %v247_v46 = vrot.slane %v1007_v34, 2  ;;  %v254_v51 = vstv %s1051_s4  ;;  %s1169_s4 = sld [smem:[#allocation8 + $0x82]] }
  0x61   :  { %618 = vperm.xlu1 %753, %v604_v1  }
  0x62   :  { %v761_v61 = vpop.eup %760 }
  0x63   :  { %389 = vperm.xlu0 %752, %v375_v26   ;;  %v102_v10 = vmul.f32 %v761_v61, %v101_v24  ;;  %v108_v13 = vmul.f32 %v761_v61, %v107_v27  ;;  %v113_v14 = vmul.f32 %v761_v61, %v112_v2  ;;  %v116_v15 = vmul.f32 %v761_v61, %v115_v28 }
  0x64   :  { %v119_v0 = vmul.f32 %v761_v61, %v118_v29  ;;  %v125_v17 = vmul.f32 %v761_v61, %v124_v30  ;;  %v128_v18 = vmul.f32 %v761_v61, %v127_v31  ;;  %v131_v19 = vmul.f32 %v761_v61, %v130_v32 }
  0x65   :  { %623 = vperm.xlu1 %753, %v605_v11   ;;  %v103_v20 = vsub.f32 1.0, %v102_v10  ;;  %v134_v8 = vmul.f32 %v761_v61, %v133_v35  ;;  %v143_v21 = vmul.f32 %v137_v62, %v108_v13  ;;  %v145_v1 = vmul.f32 %v138_v63, %v113_v14 }
  0x66   :  { %v120_v22 = vsub.f32 1.0, %v119_v0  ;;  %v151_v23 = vmul.f32 %v136_v16, %v116_v15  ;;  %v154_v9 = vmul.f32 %v138_v63, %v125_v17  ;;  %v160_v24 = vmul.f32 %v136_v16, %v128_v18 }
  0x67   :  { %394 = vperm.xlu0 %752, %v376_v33   ;;  %v135_v25 = vsub.f32 1.0, %v134_v8  ;;  %v142_v26 = vmul.f32 %v136_v16, %v103_v20  ;;  %v161_v27 = vmul.f32 %v137_v62, %v131_v19  ;;  %v207_v28 = vadd.f32 %v205_v57, %v200_v53  ;;  %v140_v53 = vld [vmem:[%s1279_s2 + $0x4] sm:$0x1] }
  0x68   :  { %v152_v2 = vmul.f32 %v137_v62, %v120_v22  ;;  %v225_v29 = vadd.f32 %v223_v5, %v218_v3  ;;  %v237_v11 = vrot.slane %v235_v7, 1  ;;  %v242_v30 = vmul.f32 %v241_v60, %v1007_v34 }
  0x69   :  { %v144_v31 = vadd.f32 %v143_v21, %v142_v26  ;;  %v162_v32 = vadd.f32 %v161_v27, %v160_v24  ;;  %v163_v33 = vmul.f32 %v138_v63, %v135_v25  ;;  %v444_v35 = vmul.f32 %v1014_v37, %v443_v48  ;;  %v141_v48 = vld [vmem:[%s1279_s2 + $0x5] sm:$0x1]  ;;  %s1100_s2 = sld [smem:[#allocation7 + $0x83]] }
  0x6a   :  { %v153_v36 = vadd.f32 %v152_v2, %v151_v23  ;;  %v208_v4 = vsub.f32 %v207_v28, %v1007_v34  ;;  %v229_v12 = vsub.f32 %v225_v29, %v227_v6  ;;  %v239_v39 = vadd.f32 %v237_v11, %v232_v58 }
  0x6b   :  { %v146_v43 = vadd.f32 %v145_v1, %v144_v31  ;;  %v164_v44 = vadd.f32 %v163_v33, %v162_v32  ;;  %v244_v45 = vrot.slane %v242_v30, 2  ;;  %v422_v60 = vstv %s1055_s10  ;;  %s1175_s10 = sld [smem:[#allocation8 + $0x84]] }
  0x6c   :  { %v155_v49 = vadd.f32 %v154_v9, %v153_v36  ;;  %v252_v57 = vadd.f32 %v251_v50, %v208_v4  ;;  %v255_v59 = vadd.f32 %v254_v51, %v229_v12  ;;  %v428_v61 = vrot.slane %v1026_v47, 1 }
  0x6d   :  { %v149_v54 = vadd.f32 %v148_v38, %v146_v43  ;;  %v167_v55 = vadd.f32 %v166_v42, %v164_v44  ;;  %v246_v56 = vadd.f32 %v244_v45, %v239_v39  ;;  %v423_v7 = vmul.f32 %v1014_v37, %v422_v60 }
  0x6e   :  { %v158_v58 = vadd.f32 %v157_v41, %v155_v49  ;;  %v259_v42 = vmul.f32 %v252_v57, %v252_v57  ;;  %v260_v5 = vmul.f32 %v255_v59, %v255_v59  ;;  %v432_v41 = vstv %s1058_s14  ;;  %s1177_s14 = sld [smem:[#allocation8 + $0x85]] }
  0x6f   :  { %v150_v62 = vsub.f32 %v149_v54, %v139_v40  ;;  %v168_v63 = vsub.f32 %v167_v55, %v141_v48  ;;  %v249_v38 = vsub.f32 %v246_v56, %v247_v46  ;;  %v433_v47 = vmul.f32 %v1014_v37, %v432_v41 }
  0x70   :  { %v159_v3 = vsub.f32 %v158_v58, %v140_v53  ;;  %v430_v16 = vadd.f32 %v428_v61, %v423_v7  ;;  %v440_v0 = vstv %s1064_s15  ;;  %v261_v17 = vadd.f32 %v260_v5, %v259_v42  ;;  %s1182_s15 = sld [smem:[#allocation8 + $0x86]] }
  0x71   :  { %v169_v10 = vmul.f32 %v150_v62, %v150_v62  ;;  %v258_v13 = vadd.f32 %v257_v52, %v249_v38  ;;  %v172_v15 = vmul.f32 %v168_v63, %v168_v63  ;;  %v435_v18 = vrot.slane %v433_v47, 2 }
  0x72   :  { %v170_v14 = vmul.f32 %v159_v3, %v159_v3  ;;  %v441_v19 = vmul.f32 %v1014_v37, %v440_v0  ;;  %v446_v20 = vrot.slane %v444_v35, 1  ;;  %v450_v1 = vstv %s1076_s18 }
  0x73   :  { %v262_v21 = vmul.f32 %v258_v13, %v258_v13  ;;  %v461_v22 = vstv %s1078_s19  ;;  %v437_v23 = vadd.f32 %v435_v18, %v430_v16  ;;  %v451_v24 = vmul.f32 %v1014_v37, %v450_v1 }
  0x74   :  { %v171_v8 = vadd.f32 %v170_v14, %v169_v10  ;;  %v448_v9 = vadd.f32 %v446_v20, %v441_v19  ;;  %v457_v25 = vrot.slane %v1014_v37, 1  ;;  %v462_v27 = vmul.f32 %v1014_v37, %v461_v22 }
  0x75   :  { %v464_v28 = vstv %s1091_s22  ;;  %v471_v2 = vstv %s1093_s23  ;;  %v438_v29 = vsub.f32 %v437_v23, %v1014_v37  ;;  %v453_v11 = vrot.slane %v451_v24, 2 }
  0x76   :  { %v1122_v26 = vadd.f32 %v172_v15, %v171_v8  ;;  %v465_v30 = vmul.f32 %v1014_v37, %v464_v28  ;;  %v472_v31 = vmul.f32 %v1014_v37, %v471_v2  ;;  %v1133_v32 = vadd.f32 %v262_v21, %v261_v17 }
  0x77   :  { %v455_v33 = vadd.f32 %v453_v11, %v448_v9  ;;  %v477_v4 = vrot.slane %v1014_v37, 2  ;;  %v481_v12 = vstv %s1100_s2  ;;  %v484_v39 = vstv %s1105_s12 }
  0x78   :  { %762 = vrsqrt.f32 %v1122_v26  ;;  %v467_v35 = vrot.slane %v465_v30, 1  ;;  %v474_v36 = vrot.slane %v472_v31, 2  ;;  %vm176_vm3 = vcmp.eq.f32.partialorder %v1122_v26, inf }
  0x79   :  { %v487_v40 = vstv %s1107_s13  ;;  %v266_v43 = vstv %s1102_s11  ;;  %v459_v44 = vsub.f32 %v455_v33, %v457_v25  ;;  %v482_v48 = vadd.f32 %v481_v12, %v438_v29 }
  0x7a   :  { %v469_v45 = vadd.f32 %v467_v35, %v462_v27  ;;  %v267_v49 = vmul.f32 %v266_v43, %v1007_v34  ;;  %v269_v50 = vstv %s1110_s24  ;;  %v276_v51 = vstv %s1112_s25 }
  0x7b   :  { %v284_v52 = vstv %s1116_s26  ;;  %v287_v53 = vstv %s1118_s27  ;;  %v485_v55 = vadd.f32 %v484_v39, %v459_v44  ;;  %v489_v56 = vmul.f32 %v482_v48, %v482_v48 }
  0x7c   :  { %v476_v54 = vadd.f32 %v474_v36, %v469_v45  ;;  %v270_v57 = vmul.f32 %v269_v50, %v1007_v34  ;;  %v277_v58 = vmul.f32 %v276_v51, %v1007_v34  ;;  %v285_v59 = vmul.f32 %v284_v52, %v1007_v34 }
  0x7d   :  { %v288_v60 = vmul.f32 %v287_v53, %v1007_v34  ;;  %v294_v61 = vstv %s1127_s28  ;;  %v490_v63 = vmul.f32 %v485_v55, %v485_v55  ;;  %v179_v3 = vand.u32 2147483648, %v1122_v26 }
  0x7e   :  { %v479_v62 = vsub.f32 %v476_v54, %v477_v4  ;;  %v272_v38 = vrot.slane %v270_v57, 1  ;;  %v295_v42 = vmul.f32 %v294_v61, %v1007_v34  ;;  %v302_v7 = vstv %s1135_s29 }
  0x7f   :  { %v290_v5 = vrot.slane %v288_v60, 1  ;;  %v305_v41 = vstv %s1137_s30  ;;  %v491_v13 = vadd.f32 %v490_v63, %v489_v56  ;;  %v279_v14 = vrot.slane %v277_v58, 2 }
  0x80   :  { %v488_v10 = vadd.f32 %v487_v40, %v479_v62  ;;  %v274_v47 = vadd.f32 %v272_v38, %v267_v49  ;;  %v297_v0 = vrot.slane %v295_v42, 2  ;;  %v306_v17 = vmul.f32 %v305_v41, %v1007_v34 }
  0x81   :  { %v292_v16 = vadd.f32 %v290_v5, %v285_v59  ;;  %v312_v18 = vstv %s1145_s8  ;;  %vm178_vm5 = vcmp.eq.f32.partialorder %v1122_v26, 0.0  ;;  %v303_v8 = vmul.f32 %v302_v7, %v1007_v34 }
  0x82   :  { %v763_v15 = vpop.eup %762  ;;  %v492_v20 = vmul.f32 %v488_v10, %v488_v10  ;;  %v308_v21 = vrot.slane %v306_v17, 1  ;;  %v313_v1 = vmul.f32 %v312_v18, %v1007_v34  ;;  %v496_v22 = vstv %s1154_s9  ;;  %v188_v18 = vld [vmem:[%s1280_s3 + $0x8] sm:$0xff] }
  0x83   :  { %v175_v19 = vmul.f32 %v763_v15, %v1122_v26  ;;  %v499_v23 = vstv %s1156_s1  ;;  %v281_v27 = vadd.f32 %v279_v14, %v274_v47  ;;  %v299_v2 = vadd.f32 %v297_v0, %v292_v16  ;;  %v718_v0 = vld [vmem:[%s1280_s3 + $0x28] sm:$0xff] }
  0x84   :  { %v493_v24 = vadd.f32 %v492_v20, %v491_v13  ;;  %v497_v30 = vmul.f32 %v1014_v37, %v496_v22  ;;  %v500_v31 = vmul.f32 %v1014_v37, %v499_v23  ;;  %v310_v33 = vadd.f32 %v308_v21, %v303_v8 }
  0x85   :  { %v177_v9 = vsel %vm176_vm3, %v1122_v26, %v175_v19  ;;  %v315_v35 = vrot.slane %v313_v1, 2  ;;  %v506_v36 = vstv %s1169_s4  ;;  %v514_v26 = vstv %s1171_s0  ;;  %v719_v1 = vld [vmem:[%s1280_s3 + $0x30] sm:$0xff] }
  0x86   :  { %v180_v28 = vsel %vm178_vm5, %v179_v3, %v177_v9  ;;  %v494_v11 = vadd.f32 %v493_v24, %v1133_v32  ;;  %v282_v39 = vsub.f32 %v281_v27, %v1007_v34  ;;  %v502_v40 = vrot.slane %v500_v31, 1  ;;  %v189_v9 = vld [vmem:[%s1280_s3 + $0x10] sm:$0xff] }
  0x87   :  { %v182_v29 = vsel %vm181_vm4, %v180_v28, 0.0  ;;  %v507_v43 = vmul.f32 %v1014_v37, %v506_v36  ;;  %v300_v32 = vsub.f32 %v299_v2, %v227_v6  ;;  %v515_v44 = vmul.f32 %v1014_v37, %v514_v26  ;;  %v190_v36 = vld [vmem:[%s1280_s3 + $0x18] sm:$0xff] }
  0x88   :  { %183 = vadd.xlane.f32.xlu0 %v182_v29  ;;  %v655_v12 = vsel %vm181_vm4, %v494_v11, 0.0  ;;  %v517_v45 = vstv %s1175_s10  ;;  %v524_v48 = vstv %s1177_s14  ;;  %v504_v49 = vadd.f32 %v502_v40, %v497_v30  ;;  %v720_v29 = vld [vmem:[%s1280_s3 + $0x38] sm:$0xff]  ;;  %s851_s3 = smov [#allocation10]  }
  0x89   :  { %v509_v50 = vrot.slane %v507_v43, 2  ;;  %v518_v51 = vmul.f32 %v1014_v37, %v517_v45  ;;  %v525_v52 = vmul.f32 %v1014_v37, %v524_v48  ;;  %v317_v53 = vadd.f32 %v315_v35, %v310_v33  ;;  %s682_s24 = sshll.u32 %s851_s3, 4  ;;  %s683_s24 = int_to_ptr.vmem [resolvable:$true] %s682_s24 }
  0x8a   :  { %v532_v54 = vstv %s1182_s15  ;;  %v535_v55 = vstv %s1187_s16  ;;  %v542_v56 = vstv %s1189_s17  ;;  %v319_v62 = vmul.f32 %v282_v39, %v282_v39  ;;  %s816_s25 = scalar_lea.vmem %s683_s24, 16  ;;  %s820_s26 = scalar_lea.vmem %s683_s24, 32 }
  0x8b   :  { %v511_v57 = vadd.f32 %v509_v50, %v504_v49  ;;  %v520_v58 = vrot.slane %v518_v51, 1  ;;  %v527_v59 = vrot.slane %v525_v52, 2  ;;  %v533_v6 = vmul.f32 %v1014_v37, %v532_v54  ;;  %p817_p6 = scmp.ne.s32.totalorder %s683_s24, %s816_s25  ;;  %p821_p7 = scmp.lt.s32.totalorder %s683_s24, %s683_s24 }
  0x8c   :  { %656 = vadd.xlane.f32.xlu0 %v655_v12  ;;  %v536_v60 = vmul.f32 %v1014_v37, %v535_v55  ;;  %v543_v61 = vmul.f32 %v1014_v37, %v542_v56  ;;  %v318_v42 = vsub.f32 %v317_v53, %v247_v46  ;;  %v320_v3 = vmul.f32 %v300_v32, %v300_v32  ;;  %p822_p8 = scmp.lt.s32.totalorder %s820_s26, %s816_s25 }
  0x8d   :  { %v512_v63 = vsub.f32 %v511_v57, %v1014_v37  ;;  %v522_v38 = vadd.f32 %v520_v58, %v515_v44  ;;  %v561_v20 = vmul.f32 %v718_v0, %v718_v0  ;;  %v329_v22 = vmul.f32 %v1007_v34, %v1007_v34 }
  0x8e   :  { %v538_v5 = vrot.slane %v536_v60, 1  ;;  %v545_v7 = vrot.slane %v543_v61, 2  ;;  %v321_v14 = vadd.f32 %v320_v3, %v319_v62  ;;  %v322_v15 = vmul.f32 %v318_v42, %v318_v42  ;;  %p823_p9 = por %p822_p8, %p821_p7 }
  0x8f   :  { %v529_v41 = vadd.f32 %v527_v59, %v522_v38  ;;  %v549_v47 = vmul.f32 %v512_v63, %v512_v63  ;;  %v562_v24 = vmul.f32 %v719_v1, %v719_v1  ;;  %v565_v28 = vsel %vm333_vm6, %v561_v20, 0.0 }
  0x90   :  { %v540_v10 = vadd.f32 %v538_v5, %v533_v6  ;;  %v323_v8 = vadd.f32 %v322_v15, %v321_v14  ;;  %v331_v11 = vmul.f32 %v189_v9, %v189_v9  ;;  %v334_v30 = vsel %vm333_vm6, %v329_v22, 0.0  ;;  %p824_p10 = pnand %p823_p9, %p817_p6 }
  0x91   :  { %v530_v13 = vsub.f32 %v529_v41, %v457_v25  ;;  %v560_v25 = vmul.f32 %v1014_v37, %v1014_v37  ;;  %v563_v26 = vmul.f32 %v720_v29, %v720_v29  ;;  %v567_v12 = vsel %vm333_vm6, %v562_v24, 0.0 }
  0x92   :  { %v547_v16 = vadd.f32 %v545_v7, %v540_v10  ;;  %v332_v40 = vmul.f32 %v190_v36, %v190_v36  ;;  %v337_v43 = vsel %vm333_vm6, %v331_v11, 0.0 }
  0x93   :  { %v550_v17 = vmul.f32 %v530_v13, %v530_v13  ;;  %v564_v27 = vsel %vm333_vm6, %v560_v25, 0.0  ;;  %v569_v44 = vsel %vm333_vm6, %v563_v26, 0.0 }
  0x94   :  { %v548_v46 = vsub.f32 %v547_v16, %v477_v4  ;;  %v330_v4 = vmul.f32 %v188_v18, %v188_v18  ;;  %v566_v35 = vadd.f32 %v565_v28, %v564_v27  ;;  %v339_v48 = vsel %vm333_vm6, %v332_v40, 0.0 }
  0x95   :  { %v551_v19 = vadd.f32 %v550_v17, %v549_v47 }
  0x96   :  { %v552_v21 = vmul.f32 %v548_v46, %v548_v46  ;;  %v335_v31 = vsel %vm333_vm6, %v330_v4, 0.0  ;;  %v568_v32 = vadd.f32 %v567_v12, %v566_v35 }
  0x97   :  { %v336_v39 = vadd.f32 %v335_v31, %v334_v30 }
  0x98   :  { %v553_v23 = vadd.f32 %v552_v21, %v551_v19  ;;  %v570_v49 = vadd.f32 %v569_v44, %v568_v32 }
  0x99   :  { %v338_v45 = vadd.f32 %v337_v43, %v336_v39 }
  0x9a   :  { %v554_v2 = vadd.f32 %v553_v23, %v323_v8  ;;  %v571_v51 = vrot.slane %v570_v49, 4 }
  0x9b   :  { %v340_v50 = vadd.f32 %v339_v48, %v338_v45 }
  0x9c   :  { %v663_v33 = vsel %vm181_vm4, %v554_v2, 0.0  ;;  %v572_v53 = vadd.f32 %v571_v51, %v570_v49 }
  0x9d   :  { %664 = vadd.xlane.f32.xlu0 %v663_v33  ;;  %v341_v52 = vrot.slane %v340_v50, 4 }
  0x9e   :  { %v573_v55 = vrot.slane %v572_v53, 2 }
  0x9f   :  { %v342_v54 = vadd.f32 %v341_v52, %v340_v50 }
  0xa0   :  { %v574_v57 = vadd.f32 %v573_v55, %v572_v53 }
  0xa1   :  { %v343_v56 = vrot.slane %v342_v54, 2 }
  0xa2   :  { %v575_v59 = vrot.slane %v574_v57, 1 }
  0xa3   :  { %v344_v58 = vadd.f32 %v343_v56, %v342_v54 }
  0xa4   :  { %v576_v60 = vadd.f32 %v575_v59, %v574_v57 }
  0xa5   :  { %v345_v6 = vrot.slane %v344_v58, 1 }
  0xa6   :  { %v577_v62 = vmax.f32 %v576_v60, 1e-24 }
  0xa7   :  { %v346_v61 = vadd.f32 %v345_v6, %v344_v58  ;;  %v651_v58 = vlaneseq }
  0xa8   :  { %764 = vrsqrt.f32 %v577_v62 }
  0xa9   :  { %v347_v63 = vmax.f32 %v346_v61, 1e-24  ;;  %v652_v6 = vand.u32 127, %v651_v58 }
  0xab   :  { %766 = vrsqrt.f32 %v347_v63  ;;  %vm653_vm7 = vcmp.eq.s32.totalorder %v652_v6, 0  ;;  %vm661_vm8 = vcmp.eq.s32.totalorder %v652_v6, 1  ;;  %vm669_vm9 = vcmp.eq.s32.totalorder %v652_v6, 2 }
  0xac   :  { %vm671_vm10 = vcmp.eq.s32.totalorder %v652_v6, 3  ;;  %vm673_vm11 = vcmp.eq.s32.totalorder %v652_v6, 4 }
  0xb2   :  { %v765_v38 = vpop.eup %764 }
  0xb3   :  { %v599_v3 = vmul.f32 %v765_v38, %v718_v0  ;;  %v598_v41 = vmul.f32 %v765_v38, %v1014_v37  ;;  %v600_v15 = vmul.f32 %v765_v38, %v719_v1  ;;  %v601_v0 = vmul.f32 %v765_v38, %v720_v29 }
  0xb5   :  { %v767_v5 = vpop.eup %766 }
  0xb6   :  { %v370_v10 = vmul.f32 %v767_v5, %v188_v18  ;;  %v369_v47 = vmul.f32 %v767_v5, %v1007_v34  ;;  %v371_v19 = vmul.f32 %v767_v5, %v189_v9  ;;  %v372_v4 = vmul.f32 %v767_v5, %v190_v36 }
  0xd8   :  { %v609_v42 = vpop.permute.xlu1 %608 }
  0xd9   :  { %v626_v17 = vmul.f32 %v609_v42, %v598_v41 }
  0xda   :  { %v380_v7 = vpop.permute.xlu0 %379 }
  0xdb   :  { %v397_v20 = vmul.f32 %v380_v7, %v369_v47  ;;  %v630_v37 = vsel %vm333_vm6, %v626_v17, 0.0 }
  0xdc   :  { %v614_v13 = vpop.permute.xlu1 %613 }
  0xdd   :  { %v627_v14 = vmul.f32 %v614_v13, %v599_v3  ;;  %v401_v27 = vsel %vm333_vm6, %v397_v20, 0.0 }
  0xde   :  { %v385_v16 = vpop.permute.xlu0 %384 }
  0xdf   :  { %v398_v46 = vmul.f32 %v385_v16, %v370_v10  ;;  %v631_v8 = vsel %vm333_vm6, %v627_v14, 0.0 }
  0xe0   :  { %v619_v25 = vpop.permute.xlu1 %618  ;;  %v632_v1 = vadd.f32 %v631_v8, %v630_v37 }
  0xe1   :  { %v628_v21 = vmul.f32 %v619_v25, %v600_v15  ;;  %v402_v18 = vsel %vm333_vm6, %v398_v46, 0.0 }
  0xe2   :  { %v390_v22 = vpop.permute.xlu0 %389  ;;  %v403_v2 = vadd.f32 %v402_v18, %v401_v27 }
  0xe3   :  { %v633_v34 = vsel %vm333_vm6, %v628_v21, 0.0  ;;  %v399_v23 = vmul.f32 %v390_v22, %v371_v19 }
  0xe4   :  { %v624_v24 = vpop.permute.xlu1 %623  ;;  %v634_v11 = vadd.f32 %v633_v34, %v632_v1 }
  0xe5   :  { %v404_v9 = vsel %vm333_vm6, %v399_v23, 0.0  ;;  %v629_v28 = vmul.f32 %v624_v24, %v601_v0 }
  0xe6   :  { %v395_v30 = vpop.permute.xlu0 %394  ;;  %v405_v33 = vadd.f32 %v404_v9, %v403_v2 }
  0xe7   :  { %v635_v29 = vsel %vm333_vm6, %v629_v28, 0.0  ;;  %v400_v31 = vmul.f32 %v395_v30, %v372_v4 }
  0xe8   :  { %v636_v35 = vadd.f32 %v635_v29, %v634_v11 }
  0xe9   :  { %v406_v36 = vsel %vm333_vm6, %v400_v31, 0.0 }
  0xea   :  { %v637_v26 = vrot.slane %v636_v35, 4  ;;  %v407_v12 = vadd.f32 %v406_v36, %v405_v33 }
  0xec   :  { %v638_v39 = vadd.f32 %v637_v26, %v636_v35  ;;  %v408_v40 = vrot.slane %v407_v12, 4 }
  0xee   :  { %v639_v43 = vrot.slane %v638_v39, 2  ;;  %v409_v32 = vadd.f32 %v408_v40, %v407_v12 }
  0xf0   :  { %v410_v44 = vrot.slane %v409_v32, 2  ;;  %v640_v45 = vadd.f32 %v639_v43, %v638_v39 }
  0xf2   :  { %v411_v48 = vadd.f32 %v410_v44, %v409_v32  ;;  %v641_v49 = vrot.slane %v640_v45, 1 }
  0xf4   :  { %v412_v50 = vrot.slane %v411_v48, 1  ;;  %v642_v51 = vadd.f32 %v641_v49, %v640_v45 }
  0xf6   :  { %v413_v52 = vadd.f32 %v412_v50, %v411_v48  ;;  %v643_v53 = vmul.f32 %v642_v51, %v642_v51 }
  0xf8   :  { %v414_v54 = vmul.f32 %v413_v52, %v413_v52 }
  0xfa   :  { %v644_v55 = vadd.f32 %v643_v53, %v414_v54 }
  0xfc   :  { %v645_v56 = vsel %vm333_vm6, %v644_v55, 0.0 }
  0xfd   :  { %646 = vadd.xlane.f32.xlu1 %v645_v56 }
 0x115   :  { %v184_v57 = vpop.xlane.xlu0 %183 }
 0x116   :  { %v185_v59 = vmul.f32 0.0625, %v184_v57 }
 0x118   :  { %v186_v61 = vmin.f32 %v185_v59, 1.0 }
 0x119   :  { %v657_v60 = vpop.xlane.xlu0 %656 }
 0x11a   :  { %v658_v62 = vmul.f32 0.010416667, %v657_v60  ;;  %v654_v42 = vsel %vm653_vm7, %v186_v61, 0.0 }
 0x11c   :  { %v662_v41 = vsel %vm661_vm8, %v658_v62, %v654_v42  ;;  %v659_v10 = vmul.f32 0.1, %v658_v62 }
 0x12a   :  { %v665_v63 = vpop.xlane.xlu0 %664 }
 0x12b   :  { %v666_v5 = vmul.f32 0.010416667, %v665_v63 }
 0x12d   :  { %v667_v13 = vmul.f32 0.1, %v666_v5  ;;  %v670_v14 = vsel %vm669_vm9, %v666_v5, %v662_v41 }
 0x18a   :  { %v647_v38 = vpop.xlane.xlu1 %646 }
 0x18b   :  { %v648_v3 = vmul.f32 0.03125, %v647_v38 }
 0x18d   :  { %v649_v7 = vmul.f32 0.1, %v648_v3  ;;  %v672_v17 = vsel %vm671_vm10, %v648_v3, %v670_v14 }
 0x18f   :  { %v650_v47 = vadd.f32 %v649_v7, %v186_v61 }
 0x191   :  { %v660_v15 = vadd.f32 %v659_v10, %v650_v47 }
 0x193   :  { %v668_v16 = vadd.f32 %v667_v13, %v660_v15 }
 0x195   :  { %v674_v46 = vsel %vm673_vm11, %v668_v16, %v672_v17 }
 0x196   :  { %675 = vst [vmem:[#allocation10] sm:$0x1] %v674_v46 }
 0x197   :  { %827 = shalt.err (!%p824_p10)
}
 0x198   :  { %s828_s29 = scalar_lea.hbm %s1284_s7, 16 }
 0x199   :  { %p829_p11 = scmp.ne.s32.totalorder %s1284_s7, %s828_s29  ;;  %p832_p12 = scmp.lt.u32.totalorder %s828_s29, %s1284_s7 }
 0x19b   :  { %p834_p13 = pnand %p832_p12, %p829_p11 }
 0x19d   :  { %837 = shalt.err (!%p834_p13)
}
 0x19e   :  { %685 = dma.vmem_to_hbm [thread:$0]  %s683_s24, 16, %s1284_s7, [#allocation3]  }
 0x19f   :  { %844 = dma.done.wait [#allocation3], 16  }
 0x1a0   :  { %845 = vsyncadd [#allocation3], 4294967280 }
 0x1a1   :  { %689 = vsyncpa [#allocation3], 1 }
 0x1a2   :  { %690 = vsyncpa [#allocation4], 1 }
 0x1a3   :  { %691 = vsyncpa [#allocation6], 1 }
 0x1a4   :  { %692 = vsyncpa [#allocation9], 1 }

</bundles_post_ra>
